<compile_context>
chip_gen: v7x
topology: tpu7x:2x2x1
jax: 0.10.0
libtpu: 0.0.40
codegen_flags: <defaults>
</compile_context>

<pallas_src>
import functools

import jax
import jax.numpy as jnp
from jax.experimental import pallas as pl
from jax.experimental.pallas import tpu as pltpu

IN_DIM = 512
HID_DIM = 512
OUT_DIM = 10
OUT_PAD = 128        # lane-dense padded output width
TM_CAP = 1024        # max rows per grid step (VMEM-budget cap)


def lp_kernel(h_ref, w1_ref, b1_ref, w2_ref, b2_ref, w3_ref, b3_ref, o_ref):
    # h is loaded as f32 and cast to bf16 in-kernel (VPU op, hides under MXU).
    h = h_ref[...].astype(jnp.bfloat16)                              # (TM, 512)
    # Layer 1: Linear(512, 512) + ReLU. bf16 MXU matmul, f32 accumulate,
    # f32 bias add + ReLU, cast back to bf16 for the next MXU pass.
    x1 = jnp.dot(h, w1_ref[...], preferred_element_type=jnp.float32) + b1_ref[...]
    x1 = jnp.maximum(x1, 0.0).astype(jnp.bfloat16)
    # Layer 2: Linear(512, 512) + ReLU
    x2 = jnp.dot(x1, w2_ref[...], preferred_element_type=jnp.float32) + b2_ref[...]
    x2 = jnp.maximum(x2, 0.0).astype(jnp.bfloat16)
    # Layer 3: Linear(512, 128-padded), no activation; f32 lane-dense store.
    out = jnp.dot(x2, w3_ref[...], preferred_element_type=jnp.float32) + b3_ref[...]
    o_ref[...] = out                                                  # (TM, 128) f32


def preprocess_params(w1, b1, w2, b2, w3, b3):
    """One-time weight preprocessing (hoisted out of the forward hot path)."""
    w3_p = jnp.zeros((HID_DIM, OUT_PAD), w3.dtype).at[:, :OUT_DIM].set(w3)
    b3_p = jnp.zeros((1, OUT_PAD), jnp.float32).at[:, :OUT_DIM].set(b3.astype(jnp.float32))
    return (w1.astype(jnp.bfloat16), b1.astype(jnp.float32),
            w2.astype(jnp.bfloat16), b2.astype(jnp.float32),
            w3_p.astype(jnp.bfloat16), b3_p)


def _choose_tiling(B, tm_cap=TM_CAP):
    """Pick (tm, num_tiles, Bp): tm multiple of 16, num_tiles even (>=2) when the
    batch is large enough to split across v7x's two TensorCores."""
    B16 = ((max(B, 1) + 15) // 16) * 16          # bf16 sublane packing
    if B16 <= tm_cap:
        if B16 >= 256:                           # enough work to split across 2 TCs
            num_tiles = 2
            tm = ((-(-B16 // 2)) + 15) // 16 * 16
        else:                                    # tiny batch: single latency-bound step
            num_tiles = 1
            tm = B16
    else:
        num_tiles = 2
        while -(-B16 // num_tiles) > tm_cap:     # even tile count, tile <= cap
            num_tiles += 2
        tm = ((-(-B16 // num_tiles)) + 15) // 16 * 16
    return tm, num_tiles, tm * num_tiles


def lp_forward(h, w1_bf, b1_f, w2_bf, b2_f, w3_bf, b3_f):
    """h: (B, 512) f32. Preprocessed params from preprocess_params(). Returns (B, 10) f32."""
    B = h.shape[0]
    tm, num_tiles, Bp = _choose_tiling(B)

    # Pad batch to the tiled extent (f32; the bf16 cast happens inside the kernel).
    h_p = h if Bp == B else jnp.pad(h, ((0, Bp - B), (0, 0)))

    resident = dict(pipeline_mode=pl.Buffered(1))   # constant index_map -> 1 buffer

    out_padded = pl.pallas_call(
        lp_kernel,
        out_shape=jax.ShapeDtypeStruct((Bp, OUT_PAD), jnp.float32),
        grid=(num_tiles,),
        in_specs=[
            pl.BlockSpec((tm, IN_DIM), lambda i: (i, 0)),                       # h tile (f32)
            pl.BlockSpec((IN_DIM, HID_DIM), lambda i: (0, 0), **resident),      # w1
            pl.BlockSpec((1, HID_DIM), lambda i: (0, 0), **resident),           # b1
            pl.BlockSpec((HID_DIM, HID_DIM), lambda i: (0, 0), **resident),     # w2
            pl.BlockSpec((1, HID_DIM), lambda i: (0, 0), **resident),           # b2
            pl.BlockSpec((HID_DIM, OUT_PAD), lambda i: (0, 0), **resident),     # w3 padded
            pl.BlockSpec((1, OUT_PAD), lambda i: (0, 0), **resident),           # b3 padded
        ],
        out_specs=pl.BlockSpec((tm, OUT_PAD), lambda i: (i, 0)),
        compiler_params=pltpu.CompilerParams(
            dimension_semantics=("parallel",),
            vmem_limit_bytes=32 << 20,
        ),
    )(h_p, w1_bf, b1_f, w2_bf, b2_f, w3_bf, b3_f)

    return out_padded[:B, :OUT_DIM]


lp_forward_jit = jax.jit(lp_forward)


def init_params(key):
    # Deterministic synthetic init (roughly PyTorch's default uniform fan-in init).
    ks = jax.random.split(key, 6)

    def lin(kw, kb, fan_in, fan_out):
        bound = 1.0 / jnp.sqrt(fan_in)
        w = jax.random.uniform(kw, (fan_in, fan_out), jnp.float32, -bound, bound)
        b = jax.random.uniform(kb, (1, fan_out), jnp.float32, -bound, bound)
        return w, b

    w1, b1 = lin(ks[0], ks[1], IN_DIM, HID_DIM)
    w2, b2 = lin(ks[2], ks[3], HID_DIM, HID_DIM)
    w3, b3 = lin(ks[4], ks[5], HID_DIM, OUT_DIM)
    return w1, b1, w2, b2, w3, b3


def lp_reference_bf16(h, w1, b1, w2, b2, w3, b3):
    # Mirrors the kernel's mixed precision: bf16 matmul inputs, f32 accum/bias/ReLU.
    x = jnp.dot(h.astype(jnp.bfloat16), w1.astype(jnp.bfloat16),
                preferred_element_type=jnp.float32) + b1
    x = jnp.maximum(x, 0.0).astype(jnp.bfloat16)
    x = jnp.dot(x, w2.astype(jnp.bfloat16),
                preferred_element_type=jnp.float32) + b2
    x = jnp.maximum(x, 0.0).astype(jnp.bfloat16)
    return jnp.dot(x, w3.astype(jnp.bfloat16),
                   preferred_element_type=jnp.float32) + b3


def lp_reference_f32(h, w1, b1, w2, b2, w3, b3):
    x = jnp.maximum(h @ w1 + b1, 0.0)
    x = jnp.maximum(x @ w2 + b2, 0.0)
    return x @ w3 + b3


if __name__ == "__main__":
    key = jax.random.PRNGKey(0)
    k_h, k_h2, k_p = jax.random.split(key, 3)
    params = init_params(k_p)
    params_pre = jax.tree_util.tree_map(
        jax.block_until_ready, preprocess_params(*params))   # one-time preprocessing

    # Case 1: B=256 -> 2 grid steps of 128 rows (exercises the parallel batch grid).
    B = 256
    h = jax.random.normal(k_h, (B, IN_DIM), jnp.float32)
    out = jax.block_until_ready(lp_forward_jit(h, *params_pre))
    assert out.shape == (B, OUT_DIM)
    ref_bf16 = lp_reference_bf16(h, *params)
    assert jnp.allclose(out, ref_bf16, atol=1e-3, rtol=1e-3)
    ref_f32 = lp_reference_f32(h, *params)
    assert jnp.allclose(out, ref_f32, atol=5e-2, rtol=5e-2)

    # Case 2: B=40 -> single padded tile of 48 rows (exercises batch padding).
    B2 = 40
    h2 = jax.random.normal(k_h2, (B2, IN_DIM), jnp.float32)
    out2 = jax.block_until_ready(lp_forward_jit(h2, *params_pre))
    assert out2.shape == (B2, OUT_DIM)
    assert jnp.allclose(out2, lp_reference_bf16(h2, *params), atol=1e-3, rtol=1e-3)

    print("KERNEL_OK")
</pallas_src>

<mosaic_0001>
module attributes {stable_mosaic.version = 11 : i64} {
  func.func @lp_kernel(%arg0: i32, %arg1: memref<128x512xf32, #tpu.memory_space<vmem>>, %arg2: memref<512x512xbf16, #tpu.memory_space<vmem>>, %arg3: memref<1x512xf32, #tpu.memory_space<vmem>>, %arg4: memref<512x512xbf16, #tpu.memory_space<vmem>>, %arg5: memref<1x512xf32, #tpu.memory_space<vmem>>, %arg6: memref<512x128xbf16, #tpu.memory_space<vmem>>, %arg7: memref<1x128xf32, #tpu.memory_space<vmem>>, %arg8: memref<128x128xf32, #tpu.memory_space<vmem>>) attributes {dimension_semantics = [#tpu.dimension_semantics<parallel>], iteration_bounds = array<i64: 2>, scalar_prefetch = 0 : i64, scratch_operands = 0 : i64, tpu.core_type = #tpu.core_type<tc>, window_params = [{transform_indices = @transform_0, window_bounds = array<i64: 128, 512>}, {pipeline_mode = #tpu.pipeline_mode<synchronous>, transform_indices = @transform_1, window_bounds = array<i64: 512, 512>}, {pipeline_mode = #tpu.pipeline_mode<synchronous>, transform_indices = @transform_2, window_bounds = array<i64: 1, 512>}, {pipeline_mode = #tpu.pipeline_mode<synchronous>, transform_indices = @transform_3, window_bounds = array<i64: 512, 512>}, {pipeline_mode = #tpu.pipeline_mode<synchronous>, transform_indices = @transform_4, window_bounds = array<i64: 1, 512>}, {pipeline_mode = #tpu.pipeline_mode<synchronous>, transform_indices = @transform_5, window_bounds = array<i64: 512, 128>}, {pipeline_mode = #tpu.pipeline_mode<synchronous>, transform_indices = @transform_6, window_bounds = array<i64: 1, 128>}, {transform_indices = @transform_7, window_bounds = array<i64: 128, 128>}]} {
    %c0 = arith.constant 0 : index
    %c0_0 = arith.constant 0 : index
    %0 = vector.load %arg1[%c0, %c0_0] : memref<128x512xf32, #tpu.memory_space<vmem>>, vector<128x512xf32>
    %1 = arith.truncf %0 : vector<128x512xf32> to vector<128x512xbf16>
    %c0_1 = arith.constant 0 : index
    %c0_2 = arith.constant 0 : index
    %2 = vector.load %arg2[%c0_1, %c0_2] : memref<512x512xbf16, #tpu.memory_space<vmem>>, vector<512x512xbf16>
    %cst = arith.constant dense<0.000000e+00> : vector<128x512xf32>
    %3 = tpu.matmul %1, %2, %cst {dimension_numbers = #tpu.dot_dimension_numbers<[1], [0], [0], [1], [0, 0, 1, 1], [], []>} : vector<128x512xbf16>, vector<512x512xbf16>, vector<128x512xf32> -> vector<128x512xf32>
    %c0_3 = arith.constant 0 : index
    %c0_4 = arith.constant 0 : index
    %4 = vector.load %arg3[%c0_3, %c0_4] : memref<1x512xf32, #tpu.memory_space<vmem>>, vector<1x512xf32>
    %5 = vector.broadcast %4 : vector<1x512xf32> to vector<128x512xf32>
    %6 = arith.addf %3, %5 : vector<128x512xf32>
    %cst_5 = arith.constant 0.000000e+00 : f32
    %7 = vector.broadcast %cst_5 : f32 to vector<128x512xf32>
    %8 = arith.maximumf %6, %7 : vector<128x512xf32>
    %9 = arith.truncf %8 : vector<128x512xf32> to vector<128x512xbf16>
    %c0_6 = arith.constant 0 : index
    %c0_7 = arith.constant 0 : index
    %10 = vector.load %arg4[%c0_6, %c0_7] : memref<512x512xbf16, #tpu.memory_space<vmem>>, vector<512x512xbf16>
    %cst_8 = arith.constant dense<0.000000e+00> : vector<128x512xf32>
    %11 = tpu.matmul %9, %10, %cst_8 {dimension_numbers = #tpu.dot_dimension_numbers<[1], [0], [0], [1], [0, 0, 1, 1], [], []>} : vector<128x512xbf16>, vector<512x512xbf16>, vector<128x512xf32> -> vector<128x512xf32>
    %c0_9 = arith.constant 0 : index
    %c0_10 = arith.constant 0 : index
    %12 = vector.load %arg5[%c0_9, %c0_10] : memref<1x512xf32, #tpu.memory_space<vmem>>, vector<1x512xf32>
    %13 = vector.broadcast %12 : vector<1x512xf32> to vector<128x512xf32>
    %14 = arith.addf %11, %13 : vector<128x512xf32>
    %cst_11 = arith.constant 0.000000e+00 : f32
    %15 = vector.broadcast %cst_11 : f32 to vector<128x512xf32>
    %16 = arith.maximumf %14, %15 : vector<128x512xf32>
    %17 = arith.truncf %16 : vector<128x512xf32> to vector<128x512xbf16>
    %c0_12 = arith.constant 0 : index
    %c0_13 = arith.constant 0 : index
    %18 = vector.load %arg6[%c0_12, %c0_13] : memref<512x128xbf16, #tpu.memory_space<vmem>>, vector<512x128xbf16>
    %cst_14 = arith.constant dense<0.000000e+00> : vector<128x128xf32>
    %19 = tpu.matmul %17, %18, %cst_14 {dimension_numbers = #tpu.dot_dimension_numbers<[1], [0], [0], [1], [0, 0, 1, 1], [], []>} : vector<128x512xbf16>, vector<512x128xbf16>, vector<128x128xf32> -> vector<128x128xf32>
    %c0_15 = arith.constant 0 : index
    %c0_16 = arith.constant 0 : index
    %20 = vector.load %arg7[%c0_15, %c0_16] : memref<1x128xf32, #tpu.memory_space<vmem>>, vector<1x128xf32>
    %21 = vector.broadcast %20 : vector<1x128xf32> to vector<128x128xf32>
    %22 = arith.addf %19, %21 : vector<128x128xf32>
    %c0_17 = arith.constant 0 : index
    %c0_18 = arith.constant 0 : index
    %23 = vector.load %arg8[%c0_17, %c0_18] : memref<128x128xf32, #tpu.memory_space<vmem>>, vector<128x128xf32>
    tpu.vector_store %arg8[%c0_17, %c0_18], %22 {strides = array<i32>} : memref<128x128xf32, #tpu.memory_space<vmem>>, vector<128x128xf32>,
    return
  }
  func.func @transform_0(%arg0: i32) -> (i32, i32) {
    %c0_i32 = arith.constant 0 : i32
    %c0_i32_0 = arith.constant 0 : i32
    return %arg0, %c0_i32 : i32, i32
  }
  func.func @transform_1(%arg0: i32) -> (i32, i32) {
    %c0_i32 = arith.constant 0 : i32
    %c0_i32_0 = arith.constant 0 : i32
    %c0_i32_1 = arith.constant 0 : i32
    return %c0_i32, %c0_i32_0 : i32, i32
  }
  func.func @transform_2(%arg0: i32) -> (i32, i32) {
    %c0_i32 = arith.constant 0 : i32
    %c0_i32_0 = arith.constant 0 : i32
    %c0_i32_1 = arith.constant 0 : i32
    return %c0_i32, %c0_i32_0 : i32, i32
  }
  func.func @transform_3(%arg0: i32) -> (i32, i32) {
    %c0_i32 = arith.constant 0 : i32
    %c0_i32_0 = arith.constant 0 : i32
    %c0_i32_1 = arith.constant 0 : i32
    return %c0_i32, %c0_i32_0 : i32, i32
  }
  func.func @transform_4(%arg0: i32) -> (i32, i32) {
    %c0_i32 = arith.constant 0 : i32
    %c0_i32_0 = arith.constant 0 : i32
    %c0_i32_1 = arith.constant 0 : i32
    return %c0_i32, %c0_i32_0 : i32, i32
  }
  func.func @transform_5(%arg0: i32) -> (i32, i32) {
    %c0_i32 = arith.constant 0 : i32
    %c0_i32_0 = arith.constant 0 : i32
    %c0_i32_1 = arith.constant 0 : i32
    return %c0_i32, %c0_i32_0 : i32, i32
  }
  func.func @transform_6(%arg0: i32) -> (i32, i32) {
    %c0_i32 = arith.constant 0 : i32
    %c0_i32_0 = arith.constant 0 : i32
    %c0_i32_1 = arith.constant 0 : i32
    return %c0_i32, %c0_i32_0 : i32, i32
  }
  func.func @transform_7(%arg0: i32) -> (i32, i32) {
    %c0_i32 = arith.constant 0 : i32
    %c0_i32_0 = arith.constant 0 : i32
    return %arg0, %c0_i32 : i32, i32
  }
}

</mosaic_0001>

<bundles_post_ra>
// kernel: lp_forward.1
= control target key start
LH: loop header
LB: loop body
LE: loop exit
PB: predicated region body
PF: predicated region fallthrough
CT: control target
= control target key end

     0   :  { %12 = vsyncpa [#allocation3], 0  ;;  %s5634_s0 = inlined_call_operand.hbm [shape: f32[256,512], index: 0, kind: input, shape index: {}]   ;;  %s5635_s1 = inlined_call_operand.hbm [shape: bf16[512,512], index: 1, kind: input, shape index: {}]   ;;  %s5636_s2 = inlined_call_operand.vmem [shape: f32[1,512], index: 2, kind: input, shape index: {}]   ;;  %s5637_s3 = inlined_call_operand.hbm [shape: bf16[512,512], index: 3, kind: input, shape index: {}]   ;;  %s5638_s4 = inlined_call_operand.vmem [shape: f32[1,512], index: 4, kind: input, shape index: {}]   ;;  %s5639_s5 = inlined_call_operand.hbm [shape: bf16[512,128], index: 5, kind: input, shape index: {}]   ;;  %s5640_s6 = inlined_call_operand.vmem [shape: f32[1,128], index: 6, kind: input, shape index: {}]   ;;  %s5641_s7 = inlined_call_operand.vmem [shape: f32[256,128], index: 7, kind: output, shape index: {}]  }
   0x1   :  { %14 = vsyncpa [#allocation3 + $0x1], 0 }
   0x2   :  { %15 = vsyncpa [#allocation5], 0 }
   0x3   :  { %16 = vsyncpa [#allocation8], 0  ;;  %s5083_s24 = smov 0   ;;  %s5085_s25 = smov 0  }
   0x4   :  { %s5087_s26 = smov 0   ;;  %s5089_s27 = smov 0  }
   0x5 LB: > { %s3688_s28 = sadd.s32 4294967295, %s5031_s27   ;;  %p42_p0 = scmp.ne.s32.totalorder %s5023_s25, %s5019_s24  ;;  %s5031_s27 = sphi %s5089_s27, %s5658_s27   ;;  %s5027_s26 = sphi %s5087_s26, %s5657_s26   ;;  %s5023_s25 = sphi %s5085_s25, %s5656_s25   ;;  %s5019_s24 = sphi %s5083_s24, %s5655_s24  }
   0x6   : > { %p5105_p1 = scmp.eq.s32.totalorder %s3688_s28, 0  ;;  %p3690_p2 = scmp.ge.s32.totalorder %s5031_s27, 1 }
   0x7   : > { %p205_p3 = scmp.lt.s32.totalorder %s5031_s27, 3  ;;  %s5033_s9 = smov [#allocation4]  }
   0x8   : > { %s5646_s29 = scalar_select %p5105_p1, 1, 0 }
   0x9   : > { %p5113_p4 = por %p5105_p1, %p42_p0  ;;  %p5117_p5 = pnand %p3690_p2, %p205_p3 }
   0xa   : > { %s217_s10 = sshll.u32 %s5033_s9, 4  ;;  %s5034_s12 = smov [#allocation6]   ;;  %s5121_s10 = int_to_ptr.vmem [resolvable:$true] %s217_s10 }
   0xb   : > { %s5647_s30 = scalar_select %p5113_p4, 1, 0 }
   0xc   : > { %s5648_s8 = scalar_select %p5117_p5, 1, 0 }
   0xd   : > { %p4397_p6 = pneg %p5117_p5  ;;  %s233_s13 = sshll.u32 %s5034_s12, 4  ;;  %s5131_s13 = int_to_ptr.vmem [resolvable:$true] %s233_s13 }
   0xe   : > { %s5035_s14 = smov [#allocation7]   ;;  %s4875_s18 = scalar_lea.hbm %s5635_s1, 16384 }
   0xf   : > { %p5127_p7 = pnand %p4397_p6, %p5105_p1  ;;  %s5133_s15 = sshll.u32 %s5035_s14, 4  ;;  %s250_s15 = int_to_ptr.vmem [resolvable:$true] %s5133_s15 }
  0x10   : > { %p4876_p8 = scmp.ne.s32.totalorder %s5635_s1, %s4875_s18  ;;  %p4882_p12 = scmp.lt.u32.totalorder %s4875_s18, %s5635_s1 }
  0x11   : > { %p5143_p9 = pneg %p5127_p7 }
  0x13   : > { %p4878_p10 = pnand %p5143_p9, %p4876_p8 }
  0x15   : > { %p4879_p11 = pneg %p4878_p10 }
  0x17   : > { %p4884_p13 = pnand %p4882_p12, %p4879_p11 }
  0x19   : > { %4887 = shalt.err (!%p4884_p13)
}
  0x1a   : > { %s4888_s24 = scalar_lea.vmem %s5121_s10, 16384  ;;  %p4896_p6 = scmp.lt.s32.totalorder %s5121_s10, %s5121_s10 }
  0x1b   : > { %p4889_p0 = scmp.ne.s32.totalorder %s5121_s10, %s4888_s24  ;;  %p4897_p1 = scmp.lt.s32.totalorder %s4888_s24, %s4888_s24 }
  0x1d   : > { %p4891_p2 = pnand %p4889_p0, %p5143_p9  ;;  %p4898_p8 = por %p4897_p1, %p4896_p6 }
  0x1f   : > { %p4892_p3 = pneg %p4891_p2 }
  0x21   : > { %p4899_p10 = pnand %p4898_p8, %p4892_p3 }
  0x23   : > { %4902 = shalt.err (!%p4899_p10)
}
  0x24   : > { %s5036_s9 = smov 256   ;;  %s5037_s12 = smov 16  }
  0x25   : > { %4400 = dma.hbm_to_vmem [thread:$0]  (!%p5127_p7), %s5635_s1, 16384, %s5121_s10, [#allocation5], %s5036_s9, %s5036_s9, %s5037_s12  }
  0x26   : > { %s4903_s19 = scalar_lea.hbm %s5637_s3, 16384 }
  0x27   : > { %p4904_p1 = scmp.ne.s32.totalorder %s5637_s3, %s4903_s19  ;;  %p4910_p13 = scmp.lt.u32.totalorder %s4903_s19, %s5637_s3 }
  0x29   : > { %p4906_p11 = pnand %p4904_p1, %p5143_p9 }
  0x2b   : > { %p4907_p12 = pneg %p4906_p11 }
  0x2d   : > { %p4912_p0 = pnand %p4910_p13, %p4907_p12 }
  0x2f   : > { %4915 = shalt.err (!%p4912_p0)
}
  0x30   : > { %s4916_s10 = scalar_lea.vmem %s5131_s13, 16384  ;;  %p4924_p8 = scmp.lt.s32.totalorder %s5131_s13, %s5131_s13 }
  0x31   : > { %p4917_p2 = scmp.ne.s32.totalorder %s5131_s13, %s4916_s10  ;;  %p4925_p10 = scmp.lt.s32.totalorder %s4916_s10, %s4916_s10 }
  0x33   : > { %p4919_p3 = pnand %p4917_p2, %p5143_p9  ;;  %p4926_p1 = por %p4925_p10, %p4924_p8 }
  0x35   : > { %p4920_p6 = pneg %p4919_p3 }
  0x37   : > { %p4927_p11 = pnand %p4926_p1, %p4920_p6 }
  0x39   : > { %4930 = shalt.err (!%p4927_p11)
}
  0x3a   : > { %4403 = dma.hbm_to_vmem [thread:$0]  (!%p5127_p7), %s5637_s3, 16384, %s5131_s13, [#allocation5], %s5036_s9, %s5036_s9, %s5037_s12  }
  0x3b   : > { %s4931_s19 = scalar_lea.hbm %s5639_s5, 4096 }
  0x3c   : > { %p4932_p12 = scmp.ne.s32.totalorder %s5639_s5, %s4931_s19  ;;  %p4938_p2 = scmp.lt.u32.totalorder %s4931_s19, %s5639_s5 }
  0x3e   : > { %p4934_p13 = pnand %p4932_p12, %p5143_p9 }
  0x40   : > { %p4935_p0 = pneg %p4934_p13 }
  0x42   : > { %p4940_p3 = pnand %p4938_p2, %p4935_p0 }
  0x44   : > { %4943 = shalt.err (!%p4940_p3)
}
  0x45   : > { %s4944_s10 = scalar_lea.vmem %s250_s15, 4096  ;;  %p4952_p1 = scmp.lt.s32.totalorder %s250_s15, %s250_s15 }
  0x46   : > { %p4945_p6 = scmp.ne.s32.totalorder %s250_s15, %s4944_s10  ;;  %p4953_p11 = scmp.lt.s32.totalorder %s4944_s10, %s4944_s10 }
  0x48   : > { %p4947_p8 = pnand %p4945_p6, %p5143_p9  ;;  %p4954_p4 = por %p4953_p11, %p4952_p1 }
  0x4a   : > { %p4948_p10 = pneg %p4947_p8 }
  0x4c   : > { %p4955_p5 = pnand %p4954_p4, %p4948_p10 }
  0x4e   : > { %4958 = shalt.err (!%p4955_p5)
}
  0x4f   : > { %s5038_s13 = smov 64   ;;  %s5039_s21 = smov 4  }
  0x50   : > { %4406 = dma.hbm_to_vmem [thread:$0]  (!%p5127_p7), %s5639_s5, 4096, %s250_s15, [#allocation8], %s5038_s13, %s5038_s13, %s5039_s21  }
  0x51   : > { %s5207_s14 = sadd.s32 1, %s5031_s27   ;;  %s29_s17 = sadd.s32 1, %s5027_s26 }
  0x52   : > { %s26_s16 = ssub.s32 %s5031_s27, %s5207_s14  ;;  %p36_p5 = scmp.ne.s32.totalorder %s5027_s26, %s5023_s25 }
  0x53   : > { %p27_p4 = scmp.eq.s32.totalorder %s26_s16, 0  ;;  %p37_p9 = scmp.eq.s32.totalorder %s5031_s27, 0 }
  0x54   : > { %p4414_p12 = scmp.lt.s32.totalorder %s5031_s27, 2  ;;  %s266_s19 = sand.u32 1, %s5027_s26  }
  0x55   : > { %s5217_s18 = scalar_select %p27_p4, %s5027_s26, %s29_s17  }
  0x56   : > { %p38_p13 = por %p37_p9, %p36_p5  ;;  %s3695_s20 = sshll.u32 %s266_s19, 9 }
  0x57   : > { %s3998_s22 = sshll.u32 %s5031_s27, 13  ;;  %s270_s15 = scalar_lea.vmem [#allocation2], %s3695_s20 }
  0x58   : > { %s5224_s24 = scalar_lea.hbm %s5634_s0, %s3998_s22  ;;  %s278_s10 = sshll.u32 %s270_s15, 4  ;;  %s5226_s10 = int_to_ptr.vmem [resolvable:$true] %s278_s10 }
  0x59   : > { %p5228_p7 = pnand %p4414_p12, %p38_p13  ;;  %s5232_s21 = scalar_lea.sflag [#allocation3], %s266_s19 }
  0x5a   : > { %s4959_s9 = scalar_lea.hbm %s5224_s24, 8192  ;;  %s4964_s17 = scalar_lea.hbm %s5634_s0, 16384 }
  0x5b   : > { %p4960_p0 = scmp.ne.s32.totalorder %s5224_s24, %s4959_s9  ;;  %p4961_p2 = pneg %p5228_p7 }
  0x5c   : > { %p4965_p8 = scmp.lt.u32.totalorder %s5224_s24, %s5634_s0  ;;  %p4966_p10 = scmp.lt.u32.totalorder %s4964_s17, %s4959_s9 }
  0x5d   : > { %p4962_p3 = pnand %p4961_p2, %p4960_p0  ;;  %p4968_p11 = scmp.lt.u32.totalorder %s4959_s9, %s5224_s24 }
  0x5e   : > { %p4967_p1 = por %p4966_p10, %p4965_p8 }
  0x5f   : > { %p4963_p6 = pneg %p4962_p3 }
  0x60   : > { %p4969_p4 = por %p4968_p11, %p4967_p1 }
  0x62   : > { %p4970_p5 = pnand %p4969_p4, %p4963_p6 }
  0x64   : > { %4973 = shalt.err (!%p4970_p5)
}
  0x65   : > { %s4974_s19 = scalar_lea.vmem %s5226_s10, 8192  ;;  %s5040_s11 = smov [#allocation2]  }
  0x66   : > { %p4975_p9 = scmp.ne.s32.totalorder %s5226_s10, %s4974_s19  ;;  %s4979_s23 = sshll.u32 %s5040_s11, 4  ;;  %s4980_s23 = int_to_ptr.vmem [resolvable:$false] %s4979_s23 }
  0x67   : > { %s4981_s15 = scalar_lea.vmem %s4980_s23, 16384  ;;  %p4982_p0 = scmp.lt.s32.totalorder %s5226_s10, %s4980_s23 }
  0x68   : > { %p4977_p12 = pnand %p4975_p9, %p4961_p2  ;;  %p4983_p3 = scmp.lt.s32.totalorder %s4981_s15, %s4974_s19 }
  0x6a   : > { %p4978_p13 = pneg %p4977_p12  ;;  %p4984_p8 = por %p4983_p3, %p4982_p0 }
  0x6c   : > { %p4985_p10 = pnand %p4984_p8, %p4978_p13 }
  0x6e   : > { %4988 = shalt.err (!%p4985_p10)
}
  0x6f   : > { %s5041_s9 = smov 512   ;;  %s5042_s12 = smov 32  }
  0x70   : > { %4410 = dma.hbm_to_vmem [thread:$0]  (!%p5228_p7), %s5224_s24, 8192, %s5226_s10, %s5232_s21, %s5041_s9, %s5041_s9, %s5042_s12  }
  0x71   : > { %p5652_p2 = scmp.ne.s32.totalorder %s5648_s8, 0 }
  0x72   : > { %s292_s16 = sand.u32 (!%p5652_p2), 1, %s5023_s25   ;;  %p5653_p6 = scmp.ne.s32.totalorder (!%p5652_p2), %s5647_s30, 0 }
  0x73   : > { %290 = sbr.rel (%p5652_p2) target bundleno = 1043 (0x413), region = 48  ;;  %s3700_s17 = sshll.u32 (!%p5652_p2), %s292_s16, 9 }
  0x74   : > { %s293_s20 = scalar_lea.sflag (!%p5652_p2), [#allocation3], %s292_s16  ;;  %s5263_s22 = scalar_lea.vmem (!%p5652_p2), [#allocation2], %s3700_s17 }
  0x7a   : > { %5006 = dma.done.wait (%p5653_p6), %s293_s20, 8192  }
  0x7b   : > { %5008 = vsyncadd (%p5653_p6), %s293_s20, 4294959104  ;;  %p5654_p1 = scmp.ne.s32.totalorder %s5646_s29, 0 }
  0x7d   : > { %5010 = dma.done.wait (%p5654_p1), [#allocation5], 32768  }
  0x7e   : > { %5012 = vsyncadd (%p5654_p1), [#allocation5], 4294934528 }
  0x7f   : > { %5014 = dma.done.wait (%p5654_p1), [#allocation8], 4096  }
  0x80   : > { %5016 = vsyncadd (%p5654_p1), [#allocation8], 4294963200  ;;  %v4459_v0 = vld [vmem:[#allocation4 + $0x4] ss:$16 sps:$4 sm:$0xff]   ;;  %v4461_v1 = vld [vmem:[#allocation4 + $0xc] ss:$16 sps:$4 sm:$0xff]  }
  0x81   : > { %1233 = vmatprep.subr.bf16.mxu0 %v4459_v0  ;;  %v4463_v2 = vld [vmem:[#allocation4] ss:$16 sps:$4 sm:$0xff]   ;;  %v4464_v3 = vld [vmem:[#allocation4 + $0x8] ss:$16 sps:$4 sm:$0xff]   ;;  %1459 = vmatprep.subr.bf16.mxu1 %v4461_v1  ;;  %v4465_v4 = vld [vmem:[#allocation4 + $0x24] ss:$16 sps:$4 sm:$0xff]  }
  0x82   : > { %1234 = vmatpush1.bf16.msra.mxu0 %v4463_v2  ;;  %1460 = vmatpush1.bf16.msra.mxu1 %v4464_v3  ;;  %v4467_v5 = vld [vmem:[#allocation4 + $0x2c] ss:$16 sps:$4 sm:$0xff]   ;;  %v4469_v6 = vld [vmem:[#allocation4 + $0x20] ss:$16 sps:$4 sm:$0xff]   ;;  %v4470_v7 = vld [vmem:[#allocation4 + $0x28] ss:$16 sps:$4 sm:$0xff]  }
  0x83   : > { %1235 = vmatprep.subr.bf16.mxu0 %v4465_v4  ;;  %1461 = vmatprep.subr.bf16.mxu1 %v4467_v5  ;;  %v4471_v8 = vld [vmem:[#allocation4 + $0x44] ss:$16 sps:$4 sm:$0xff]   ;;  %v4473_v9 = vld [vmem:[#allocation4 + $0x4c] ss:$16 sps:$4 sm:$0xff]   ;;  %v4475_v10 = vld [vmem:[#allocation4 + $0x40] ss:$16 sps:$4 sm:$0xff]  }
  0x84   : > { %v4476_v11 = vld [vmem:[#allocation4 + $0x48] ss:$16 sps:$4 sm:$0xff]   ;;  %v4477_v12 = vld [vmem:[#allocation4 + $0x64] ss:$16 sps:$4 sm:$0xff]   ;;  %v4479_v13 = vld [vmem:[#allocation4 + $0x6c] ss:$16 sps:$4 sm:$0xff]  }
  0x85   : > { %v4481_v14 = vld [vmem:[#allocation4 + $0x60] ss:$16 sps:$4 sm:$0xff]   ;;  %v4482_v15 = vld [vmem:[#allocation4 + $0x68] ss:$16 sps:$4 sm:$0xff]   ;;  %v4483_v16 = vld [vmem:[#allocation4 + $0x84] ss:$16 sps:$4 sm:$0xff]  }
  0x86   : > { %1236 = vmatpush1.bf16.msra.mxu0 %v4469_v6  ;;  %1462 = vmatpush1.bf16.msra.mxu1 %v4470_v7  ;;  %v4485_v17 = vld [vmem:[#allocation4 + $0x8c] ss:$16 sps:$4 sm:$0xff]   ;;  %v4487_v18 = vld [vmem:[#allocation4 + $0x80] ss:$16 sps:$4 sm:$0xff]   ;;  %v4488_v19 = vld [vmem:[#allocation4 + $0x88] ss:$16 sps:$4 sm:$0xff]  }
  0x87   : > { %1237 = vmatprep.subr.bf16.mxu0 %v4471_v8  ;;  %1463 = vmatprep.subr.bf16.mxu1 %v4473_v9  ;;  %v4489_v20 = vld [vmem:[#allocation4 + $0xa4] ss:$16 sps:$4 sm:$0xff]   ;;  %v4491_v21 = vld [vmem:[#allocation4 + $0xac] ss:$16 sps:$4 sm:$0xff]   ;;  %v4493_v22 = vld [vmem:[#allocation4 + $0xa0] ss:$16 sps:$4 sm:$0xff]  }
  0x88   : > { %v4494_v23 = vld [vmem:[#allocation4 + $0xa8] ss:$16 sps:$4 sm:$0xff]   ;;  %v4495_v24 = vld [vmem:[#allocation4 + $0xc4] ss:$16 sps:$4 sm:$0xff]   ;;  %v4497_v25 = vld [vmem:[#allocation4 + $0xcc] ss:$16 sps:$4 sm:$0xff]  }
  0x89   : > { %v4499_v26 = vld [vmem:[#allocation4 + $0xc0] ss:$16 sps:$4 sm:$0xff]   ;;  %v4500_v27 = vld [vmem:[#allocation4 + $0xc8] ss:$16 sps:$4 sm:$0xff]   ;;  %v4501_v28 = vld [vmem:[#allocation4 + $0xe4] ss:$16 sps:$4 sm:$0xff]  }
  0x8a   : > { %1238 = vmatpush1.bf16.msra.mxu0 %v4475_v10  ;;  %1464 = vmatpush1.bf16.msra.mxu1 %v4476_v11  ;;  %v4503_v29 = vld [vmem:[#allocation4 + $0xec] ss:$16 sps:$4 sm:$0xff]   ;;  %v4505_v30 = vld [vmem:[#allocation4 + $0xe0] ss:$16 sps:$4 sm:$0xff]   ;;  %v4506_v31 = vld [vmem:[#allocation4 + $0xe8] ss:$16 sps:$4 sm:$0xff]  }
  0x8b   : > { %1239 = vmatprep.subr.bf16.mxu0 %v4477_v12  ;;  %1465 = vmatprep.subr.bf16.mxu1 %v4479_v13  ;;  %v4507_v32 = vld [vmem:[#allocation4 + $0x104] ss:$16 sps:$4 sm:$0xff]   ;;  %v4509_v33 = vld [vmem:[#allocation4 + $0x10c] ss:$16 sps:$4 sm:$0xff]   ;;  %v4511_v34 = vld [vmem:[#allocation4 + $0x100] ss:$16 sps:$4 sm:$0xff]  }
  0x8c   : > { %v4512_v35 = vld [vmem:[#allocation4 + $0x108] ss:$16 sps:$4 sm:$0xff]   ;;  %v4513_v36 = vld [vmem:[#allocation4 + $0x124] ss:$16 sps:$4 sm:$0xff]   ;;  %v4515_v37 = vld [vmem:[#allocation4 + $0x12c] ss:$16 sps:$4 sm:$0xff]  }
  0x8d   : > { %v4517_v38 = vld [vmem:[#allocation4 + $0x120] ss:$16 sps:$4 sm:$0xff]   ;;  %v4518_v39 = vld [vmem:[#allocation4 + $0x128] ss:$16 sps:$4 sm:$0xff]   ;;  %v4519_v40 = vld [vmem:[#allocation4 + $0x144] ss:$16 sps:$4 sm:$0xff]  }
  0x8e   : > { %1240 = vmatpush1.bf16.msra.mxu0 %v4481_v14  ;;  %1466 = vmatpush1.bf16.msra.mxu1 %v4482_v15  ;;  %v4521_v41 = vld [vmem:[#allocation4 + $0x14c] ss:$16 sps:$4 sm:$0xff]   ;;  %v4523_v42 = vld [vmem:[#allocation4 + $0x140] ss:$16 sps:$4 sm:$0xff]   ;;  %v4524_v43 = vld [vmem:[#allocation4 + $0x148] ss:$16 sps:$4 sm:$0xff]  }
  0x8f   : > { %1241 = vmatprep.subr.bf16.mxu0 %v4483_v16  ;;  %1467 = vmatprep.subr.bf16.mxu1 %v4485_v17  ;;  %v4525_v44 = vld [vmem:[#allocation4 + $0x164] ss:$16 sps:$4 sm:$0xff]   ;;  %v4527_v45 = vld [vmem:[#allocation4 + $0x16c] ss:$16 sps:$4 sm:$0xff]   ;;  %v4529_v47 = vld [vmem:[#allocation4 + $0x160] ss:$16 sps:$4 sm:$0xff]  }
  0x90   : > { %v348_v46 = vld [vmem:[%s5263_s22 + $0x8] sm:$0xff]  ;;  %v4531_v50 = vld [vmem:[#allocation4 + $0x184] ss:$16 sps:$4 sm:$0xff]   ;;  %v4535_v53 = vld [vmem:[#allocation4 + $0x180] ss:$16 sps:$4 sm:$0xff]   ;;  %s3704_s10 = sshll.u32 %s3688_s28, 4 }
  0x91   : > { %v4530_v48 = vld [vmem:[#allocation4 + $0x168] ss:$16 sps:$4 sm:$0xff]   ;;  %v4533_v52 = vld [vmem:[#allocation4 + $0x18c] ss:$16 sps:$4 sm:$0xff]   ;;  %v4537_v55 = vld [vmem:[#allocation4 + $0x1a4] ss:$16 sps:$4 sm:$0xff]  }
  0x92   : > { %1242 = vmatpush1.bf16.msra.mxu0 %v4487_v18  ;;  %1468 = vmatpush1.bf16.msra.mxu1 %v4488_v19  ;;  %v352_v49 = vld [vmem:[%s5263_s22 + $0x28] sm:$0xff]  ;;  %v4541_v57 = vld [vmem:[#allocation4 + $0x1a0] ss:$16 sps:$4 sm:$0xff]   ;;  %v4543_v59 = vld [vmem:[#allocation4 + $0x1c4] ss:$16 sps:$4 sm:$0xff]   ;;  %p341_p7 = scmp.lt.s32.totalorder %s3704_s10, 31 }
  0x93   : > { %1243 = vmatprep.subr.bf16.mxu0 %v4489_v20  ;;  %1469 = vmatprep.subr.bf16.mxu1 %v4491_v21  ;;  %v412_v51 = vpack.c.bf16 %v352_v49, %v348_v46  ;;  %v4536_v54 = vld [vmem:[#allocation4 + $0x188] ss:$16 sps:$4 sm:$0xff]   ;;  %v4539_v56 = vld [vmem:[#allocation4 + $0x1ac] ss:$16 sps:$4 sm:$0xff]   ;;  %v4547_v61 = vld [vmem:[#allocation4 + $0x1c0] ss:$16 sps:$4 sm:$0xff]  }
  0x94   : > { %v4542_v58 = vld [vmem:[#allocation4 + $0x1a8] ss:$16 sps:$4 sm:$0xff]   ;;  %v4545_v60 = vld [vmem:[#allocation4 + $0x1cc] ss:$16 sps:$4 sm:$0xff]   ;;  %v4549_v63 = vld [vmem:[#allocation4 + $0x1e4] ss:$16 sps:$4 sm:$0xff]  }
  0x95   : > { %1265 = vmatprep.mubr.bf16.mxu0 %v412_v51  ;;  %1491 = vmatprep.mubr.bf16.mxu1 %v412_v51  ;;  %v4548_v62 = vld [vmem:[#allocation4 + $0x1c8] ss:$16 sps:$4 sm:$0xff]   ;;  %v4551_v0 = vld [vmem:[#allocation4 + $0x1ec] ss:$16 sps:$4 sm:$0xff]   ;;  %v4553_v1 = vld [vmem:[#allocation4 + $0x1e0] ss:$16 sps:$4 sm:$0xff]  }
  0x96   : > { %1244 = vmatpush1.bf16.msra.mxu0 %v4493_v22  ;;  %1470 = vmatpush1.bf16.msra.mxu1 %v4494_v23  ;;  %v4554_v2 = vld [vmem:[#allocation4 + $0x1e8] ss:$16 sps:$4 sm:$0xff]   ;;  %v347_v3 = vld [vmem:[%s5263_s22] sm:$0xff]  ;;  %v4560_v6 = vld [vmem:[#allocation4 + $0x20c] ss:$16 sps:$4 sm:$0xff]   ;;  %s5660_s10 = smov (!%p341_p7, %s3704_s10), 31 }
  0x97   : > { %1245 = vmatprep.subr.bf16.mxu0 %v4495_v24  ;;  %1471 = vmatprep.subr.bf16.mxu1 %v4497_v25  ;;  %v351_v4 = vld [vmem:[%s5263_s22 + $0x20] sm:$0xff]  ;;  %v4558_v9 = vld [vmem:[#allocation4 + $0x208] ss:$16 sps:$4 sm:$0xff]   ;;  %v4566_v13 = vld [vmem:[#allocation4 + $0x22c] ss:$16 sps:$4 sm:$0xff]   ;;  %s3705_s19 = sshll.u32 %s5660_s10, 3 }
  0x98   : > { %v4557_v5 = vld [vmem:[#allocation4 + $0x204] ss:$16 sps:$4 sm:$0xff]   ;;  %v4555_v7 = vld [vmem:[#allocation4 + $0x200] ss:$16 sps:$4 sm:$0xff]   ;;  %v411_v8 = vpack.c.bf16 %v351_v4, %v347_v3  ;;  %v356_v10 = vld [vmem:[%s5263_s22 + $0x48] sm:$0xff]  ;;  %s5588_s11 = scalar_lea.vmem %s5641_s7, %s3705_s19 }
  0x99   : > { %v360_v11 = vld [vmem:[%s5263_s22 + $0x68] sm:$0xff]  ;;  %v4563_v12 = vld [vmem:[#allocation4 + $0x224] ss:$16 sps:$4 sm:$0xff]   ;;  %v4561_v14 = vld [vmem:[#allocation4 + $0x220] ss:$16 sps:$4 sm:$0xff]  }
  0x9a   : > { %1246 = vmatpush1.bf16.msra.mxu0 %v4499_v26  ;;  %1472 = vmatpush1.bf16.msra.mxu1 %v4500_v27  ;;  %v416_v15 = vpack.c.bf16 %v360_v11, %v356_v10  ;;  %v4564_v16 = vld [vmem:[#allocation4 + $0x228] ss:$16 sps:$4 sm:$0xff]   ;;  %v355_v17 = vld [vmem:[%s5263_s22 + $0x40] sm:$0xff]  ;;  %v4572_v20 = vld [vmem:[#allocation4 + $0x24c] ss:$16 sps:$4 sm:$0xff]  }
  0x9b   : > { %1247 = vmatprep.subr.bf16.mxu0 %v4501_v28  ;;  %1473 = vmatprep.subr.bf16.mxu1 %v4503_v29  ;;  %v359_v18 = vld [vmem:[%s5263_s22 + $0x60] sm:$0xff]  ;;  %v4570_v22 = vld [vmem:[#allocation4 + $0x248] ss:$16 sps:$4 sm:$0xff]   ;;  %v4578_v27 = vld [vmem:[#allocation4 + $0x26c] ss:$16 sps:$4 sm:$0xff]  }
  0x9c   : > { %v4569_v19 = vld [vmem:[#allocation4 + $0x244] ss:$16 sps:$4 sm:$0xff]   ;;  %v4567_v21 = vld [vmem:[#allocation4 + $0x240] ss:$16 sps:$4 sm:$0xff]   ;;  %v415_v23 = vpack.c.bf16 %v359_v18, %v355_v17  ;;  %v364_v24 = vld [vmem:[%s5263_s22 + $0x88] sm:$0xff] }
  0x9d   : > { %v368_v25 = vld [vmem:[%s5263_s22 + $0xa8] sm:$0xff]  ;;  %v4575_v26 = vld [vmem:[#allocation4 + $0x264] ss:$16 sps:$4 sm:$0xff]   ;;  %v4573_v29 = vld [vmem:[#allocation4 + $0x260] ss:$16 sps:$4 sm:$0xff]  }
  0x9e   : > { %1248 = vmatpush1.bf16.msra.mxu0 %v4505_v30  ;;  %1474 = vmatpush1.bf16.msra.mxu1 %v4506_v31  ;;  %v420_v28 = vpack.c.bf16 %v368_v25, %v364_v24  ;;  %v4576_v30 = vld [vmem:[#allocation4 + $0x268] ss:$16 sps:$4 sm:$0xff]   ;;  %v363_v31 = vld [vmem:[%s5263_s22 + $0x80] sm:$0xff] }
  0x9f   : > { %1249 = vmatprep.subr.bf16.mxu0 %v4507_v32  ;;  %1475 = vmatprep.subr.bf16.mxu1 %v4509_v33  ;;  %v367_v32 = vld [vmem:[%s5263_s22 + $0xa0] sm:$0xff]  ;;  %v380_v51 = vld [vmem:[%s5263_s22 + $0x108] sm:$0xff] }
  0xa0   : > { %v4581_v33 = vld [vmem:[#allocation4 + $0x284] ss:$16 sps:$4 sm:$0xff]   ;;  %v4591_v49 = vld [vmem:[#allocation4 + $0x2c0] ss:$16 sps:$4 sm:$0xff]   ;;  %v4606_v3 = vld [vmem:[#allocation4 + $0x308] ss:$16 sps:$4 sm:$0xff]  }
  0xa1   : > { %v375_v46 = vld [vmem:[%s5263_s22 + $0xe0] sm:$0xff]  ;;  %v4618_v17 = vld [vmem:[#allocation4 + $0x348] ss:$16 sps:$4 sm:$0xff]  }
  0xa2   : > { %1250 = vmatpush1.bf16.msra.mxu0 %v4511_v34  ;;  %1476 = vmatpush1.bf16.msra.mxu1 %v4512_v35  ;;  %v4584_v34 = vld [vmem:[#allocation4 + $0x28c] ss:$16 sps:$4 sm:$0xff]   ;;  %v4579_v35 = vld [vmem:[#allocation4 + $0x280] ss:$16 sps:$4 sm:$0xff]   ;;  %v4611_v4 = vld [vmem:[#allocation4 + $0x324] ss:$16 sps:$4 sm:$0xff]  }
  0xa3   : > { %1251 = vmatprep.subr.bf16.mxu0 %v4513_v36  ;;  %1477 = vmatprep.subr.bf16.mxu1 %v4515_v37  ;;  %v4582_v36 = vld [vmem:[#allocation4 + $0x288] ss:$16 sps:$4 sm:$0xff]   ;;  %v419_v37 = vpack.c.bf16 %v367_v32, %v363_v31  ;;  %v391_v10 = vld [vmem:[%s5263_s22 + $0x160] sm:$0xff] }
  0xa4   : > { %v4617_v11 = vld [vmem:[#allocation4 + $0x344] ss:$16 sps:$4 sm:$0xff]   ;;  %v408_v31 = vld [vmem:[%s5263_s22 + $0x1e8] sm:$0xff] }
  0xa5   : > { %v4623_v18 = vld [vmem:[#allocation4 + $0x364] ss:$16 sps:$4 sm:$0xff]  }
  0xa6   : > { %1252 = vmatpush1.bf16.msra.mxu0 %v4517_v38  ;;  %1478 = vmatpush1.bf16.msra.mxu1 %v4518_v39  ;;  %v372_v38 = vld [vmem:[%s5263_s22 + $0xc8] sm:$0xff]  ;;  %v399_v24 = vld [vmem:[%s5263_s22 + $0x1a0] sm:$0xff] }
  0xa7   : > { %1253 = vmatprep.subr.bf16.mxu0 %v4519_v40  ;;  %1479 = vmatprep.subr.bf16.mxu1 %v4521_v41  ;;  %v376_v39 = vld [vmem:[%s5263_s22 + $0xe8] sm:$0xff]  ;;  %v4587_v40 = vld [vmem:[#allocation4 + $0x2a4] ss:$16 sps:$4 sm:$0xff]  }
  0xa8   : > { %v4590_v41 = vld [vmem:[#allocation4 + $0x2ac] ss:$16 sps:$4 sm:$0xff]   ;;  %v4629_v25 = vld [vmem:[#allocation4 + $0x384] ss:$16 sps:$4 sm:$0xff]  }
  0xa9   : > { %v4635_v32 = vld [vmem:[#allocation4 + $0x3a4] ss:$16 sps:$4 sm:$0xff]  }
  0xaa   : > { %1254 = vmatpush1.bf16.msra.mxu0 %v4523_v42  ;;  %1480 = vmatpush1.bf16.msra.mxu1 %v4524_v43  ;;  %v4585_v42 = vld [vmem:[#allocation4 + $0x2a0] ss:$16 sps:$4 sm:$0xff]   ;;  %v424_v43 = vpack.c.bf16 %v376_v39, %v372_v38  ;;  %v4641_v39 = vld [vmem:[#allocation4 + $0x3c4] ss:$16 sps:$4 sm:$0xff]  }
  0xab   : > { %1255 = vmatprep.subr.bf16.mxu0 %v4525_v44  ;;  %1481 = vmatprep.subr.bf16.mxu1 %v4527_v45  ;;  %v4588_v44 = vld [vmem:[#allocation4 + $0x2a8] ss:$16 sps:$4 sm:$0xff]   ;;  %v371_v45 = vld [vmem:[%s5263_s22 + $0xc0] sm:$0xff] }
  0xac   : > { %v407_v38 = vld [vmem:[%s5263_s22 + $0x1e0] sm:$0xff] }
  0xae   : > { %1256 = vmatpush1.bf16.msra.mxu0 %v4529_v47  ;;  %1482 = vmatpush1.bf16.msra.mxu1 %v4530_v48  ;;  %v4593_v47 = vld [vmem:[#allocation4 + $0x2c4] ss:$16 sps:$4 sm:$0xff]   ;;  %v4596_v48 = vld [vmem:[#allocation4 + $0x2cc] ss:$16 sps:$4 sm:$0xff]  }
  0xaf   : > { %1257 = vmatprep.subr.bf16.mxu0 %v4531_v50  ;;  %1483 = vmatprep.subr.bf16.mxu1 %v4533_v52  ;;  %v423_v50 = vpack.c.bf16 %v375_v46, %v371_v45  ;;  %v384_v52 = vld [vmem:[%s5263_s22 + $0x128] sm:$0xff]  ;;  %v354_v45 = vld [vmem:[%s5263_s22 + $0x38] sm:$0xff]  ;;  %v4647_v46 = vld [vmem:[#allocation4 + $0x3e4] ss:$16 sps:$4 sm:$0xff]  }
  0xb2   : > { %1258 = vmatpush1.bf16.msra.mxu0 %v4535_v53  ;;  %1484 = vmatpush1.bf16.msra.mxu1 %v4536_v54  ;;  %v4594_v53 = vld [vmem:[#allocation4 + $0x2c8] ss:$16 sps:$4 sm:$0xff]   ;;  %v4599_v54 = vld [vmem:[#allocation4 + $0x2e4] ss:$16 sps:$4 sm:$0xff]  }
  0xb3   : > { %1259 = vmatprep.subr.bf16.mxu0 %v4537_v55  ;;  %1485 = vmatprep.subr.bf16.mxu1 %v4539_v56  ;;  %v4602_v55 = vld [vmem:[#allocation4 + $0x2ec] ss:$16 sps:$4 sm:$0xff]   ;;  %v4597_v56 = vld [vmem:[#allocation4 + $0x2e0] ss:$16 sps:$4 sm:$0xff]  }
  0xb6   : > { %1260 = vmatpush1.bf16.msra.mxu0 %v4541_v57  ;;  %1486 = vmatpush1.bf16.msra.mxu1 %v4542_v58  ;;  %v4600_v57 = vld [vmem:[#allocation4 + $0x2e8] ss:$16 sps:$4 sm:$0xff]   ;;  %v428_v58 = vpack.c.bf16 %v384_v52, %v380_v51  ;;  %v349_v51 = vld [vmem:[%s5263_s22 + $0x10] sm:$0xff] }
  0xb7   : > { %1261 = vmatprep.subr.bf16.mxu0 %v4543_v59  ;;  %1487 = vmatprep.subr.bf16.mxu1 %v4545_v60  ;;  %v379_v59 = vld [vmem:[%s5263_s22 + $0x100] sm:$0xff]  ;;  %v353_v52 = vld [vmem:[%s5263_s22 + $0x30] sm:$0xff] }
  0xb8   : > { %v383_v60 = vld [vmem:[%s5263_s22 + $0x120] sm:$0xff] }
  0xba   : > { %1262 = vmatpush1.bf16.msra.mxu0 %v4547_v61  ;;  %1488 = vmatpush1.bf16.msra.mxu1 %v4548_v62  ;;  %v4605_v61 = vld [vmem:[#allocation4 + $0x304] ss:$16 sps:$4 sm:$0xff]   ;;  %v4608_v62 = vld [vmem:[#allocation4 + $0x30c] ss:$16 sps:$4 sm:$0xff]  }
  0xbb   : > { %1263 = vmatprep.subr.bf16.mxu0 %v4549_v63  ;;  %1489 = vmatprep.subr.bf16.mxu1 %v4551_v0  ;;  %v427_v63 = vpack.c.bf16 %v383_v60, %v379_v59  ;;  %v388_v0 = vld [vmem:[%s5263_s22 + $0x148] sm:$0xff]  ;;  %v4651_v59 = vld [vmem:[#allocation6] ss:$16 sps:$4 sm:$0xff]  }
  0xbc   : > { %v4654_v60 = vld [vmem:[#allocation6 + $0x8] ss:$16 sps:$4 sm:$0xff]  }
  0xbe   : > { %1264 = vmatpush1.bf16.msra.mxu0 %v4553_v1  ;;  %1490 = vmatpush1.bf16.msra.mxu1 %v4554_v2  ;;  %v392_v1 = vld [vmem:[%s5263_s22 + $0x168] sm:$0xff]  ;;  %v4603_v2 = vld [vmem:[#allocation4 + $0x300] ss:$16 sps:$4 sm:$0xff]  }
  0xbf   : > { %1346 = vmatprep.subr.bf16.mxu0 %v4557_v5  ;;  %1572 = vmatprep.subr.bf16.mxu1 %v4560_v6  ;;  %v4614_v5 = vld [vmem:[#allocation4 + $0x32c] ss:$16 sps:$4 sm:$0xff]   ;;  %v432_v6 = vpack.c.bf16 %v392_v1, %v388_v0 }
  0xc0   : > { %v4662_v0 = vld [vmem:[#allocation6 + $0x2c] ss:$16 sps:$4 sm:$0xff]  }
  0xc1   : > { %1266 = vmatmul.mubr.bf16.vlgmr.msra.gmra.mrb[0].mxu0 %v411_v8  ;;  %1492 = vmatmul.mubr.bf16.vlgmr.msra.gmra.mrb[0].mxu1 %v411_v8  ;;  %v4612_v8 = vld [vmem:[#allocation4 + $0x328] ss:$16 sps:$4 sm:$0xff]  }
  0xc2   : > { %1347 = vmatpush1.bf16.msra.mxu0 %v4555_v7  ;;  %1573 = vmatpush1.bf16.msra.mxu1 %v4558_v9  ;;  %v4609_v7 = vld [vmem:[#allocation4 + $0x320] ss:$16 sps:$4 sm:$0xff]   ;;  %v366_v1 = vld [vmem:[%s5263_s22 + $0x98] sm:$0xff] }
  0xc3   : > { %1348 = vmatprep.subr.bf16.mxu0 %v4563_v12  ;;  %1574 = vmatprep.subr.bf16.mxu1 %v4566_v13  ;;  %v387_v9 = vld [vmem:[%s5263_s22 + $0x140] sm:$0xff]  ;;  %v4620_v12 = vld [vmem:[#allocation4 + $0x34c] ss:$16 sps:$4 sm:$0xff]  }
  0xc4   : > { %1275 = vmatprep.mubr.bf16.mxu0 %v416_v15  ;;  %1501 = vmatprep.mubr.bf16.mxu1 %v416_v15  ;;  %v431_v13 = vpack.c.bf16 %v391_v10, %v387_v9  ;;  %v400_v15 = vld [vmem:[%s5263_s22 + $0x1a8] sm:$0xff]  ;;  %v4663_v9 = vld [vmem:[#allocation6 + $0x40] ss:$16 sps:$4 sm:$0xff]  }
  0xc5   : > { %v4666_v10 = vld [vmem:[#allocation6 + $0x48] ss:$16 sps:$4 sm:$0xff]  }
  0xc6   : > { %1349 = vmatpush1.bf16.msra.mxu0 %v4561_v14  ;;  %1575 = vmatpush1.bf16.msra.mxu1 %v4564_v16  ;;  %v396_v14 = vld [vmem:[%s5263_s22 + $0x188] sm:$0xff]  ;;  %v4615_v16 = vld [vmem:[#allocation4 + $0x340] ss:$16 sps:$4 sm:$0xff]  }
  0xc7   : > { %1350 = vmatprep.subr.bf16.mxu0 %v4569_v19  ;;  %1576 = vmatprep.subr.bf16.mxu1 %v4572_v20  ;;  %v4626_v19 = vld [vmem:[#allocation4 + $0x36c] ss:$16 sps:$4 sm:$0xff]   ;;  %v4621_v20 = vld [vmem:[#allocation4 + $0x360] ss:$16 sps:$4 sm:$0xff]  }
  0xc9   : > { %1276 = vmatmul.mubr.bf16.gmra.mrb[4].mxu0 %v415_v23  ;;  %1502 = vmatmul.mubr.bf16.gmra.mrb[4].mxu1 %v415_v23  ;;  %v395_v23 = vld [vmem:[%s5263_s22 + $0x180] sm:$0xff] }
  0xca   : > { %1351 = vmatpush1.bf16.msra.mxu0 %v4567_v21  ;;  %1577 = vmatpush1.bf16.msra.mxu1 %v4570_v22  ;;  %v4624_v21 = vld [vmem:[#allocation4 + $0x368] ss:$16 sps:$4 sm:$0xff]   ;;  %v436_v22 = vpack.c.bf16 %v400_v15, %v396_v14  ;;  %v4674_v14 = vld [vmem:[#allocation6 + $0x6c] ss:$16 sps:$4 sm:$0xff]  }
  0xcb   : > { %1352 = vmatprep.subr.bf16.mxu0 %v4575_v26  ;;  %1578 = vmatprep.subr.bf16.mxu1 %v4578_v27  ;;  %v4632_v26 = vld [vmem:[#allocation4 + $0x38c] ss:$16 sps:$4 sm:$0xff]   ;;  %v4627_v27 = vld [vmem:[#allocation4 + $0x380] ss:$16 sps:$4 sm:$0xff]  }
  0xcc   : > { %1285 = vmatprep.mubr.bf16.mxu0 %v420_v28  ;;  %1511 = vmatprep.mubr.bf16.mxu1 %v420_v28  ;;  %v4630_v28 = vld [vmem:[#allocation4 + $0x388] ss:$16 sps:$4 sm:$0xff]  }
  0xcd   : > { %v374_v15 = vld [vmem:[%s5263_s22 + $0xd8] sm:$0xff] }
  0xce   : > { %1353 = vmatpush1.bf16.msra.mxu0 %v4573_v29  ;;  %1579 = vmatpush1.bf16.msra.mxu1 %v4576_v30  ;;  %v435_v29 = vpack.c.bf16 %v399_v24, %v395_v23  ;;  %v404_v30 = vld [vmem:[%s5263_s22 + $0x1c8] sm:$0xff] }
  0xcf   : > { %1354 = vmatprep.subr.bf16.mxu0 %v4581_v33  ;;  %1580 = vmatprep.subr.bf16.mxu1 %v4584_v34  ;;  %v4638_v33 = vld [vmem:[#allocation4 + $0x3ac] ss:$16 sps:$4 sm:$0xff]   ;;  %v4633_v34 = vld [vmem:[#allocation4 + $0x3a0] ss:$16 sps:$4 sm:$0xff]   ;;  %v4678_v23 = vld [vmem:[#allocation6 + $0x88] ss:$16 sps:$4 sm:$0xff]  }
  0xd1   : > { %1286 = vmatmul.mubr.bf16.gmra.mrb[8].mxu0 %v419_v37  ;;  %1512 = vmatmul.mubr.bf16.gmra.mrb[8].mxu1 %v419_v37  ;;  %v403_v37 = vld [vmem:[%s5263_s22 + $0x1c0] sm:$0xff] }
  0xd2   : > { %1355 = vmatpush1.bf16.msra.mxu0 %v4579_v35  ;;  %1581 = vmatpush1.bf16.msra.mxu1 %v4582_v36  ;;  %v4636_v35 = vld [vmem:[#allocation4 + $0x3a8] ss:$16 sps:$4 sm:$0xff]   ;;  %v440_v36 = vpack.c.bf16 %v408_v31, %v404_v30  ;;  %v4681_v31 = vld [vmem:[#allocation6 + $0xa0] ss:$16 sps:$4 sm:$0xff]  }
  0xd3   : > { %1356 = vmatprep.subr.bf16.mxu0 %v4587_v40  ;;  %1582 = vmatprep.subr.bf16.mxu1 %v4590_v41  ;;  %v4644_v40 = vld [vmem:[#allocation4 + $0x3cc] ss:$16 sps:$4 sm:$0xff]   ;;  %v4639_v41 = vld [vmem:[#allocation4 + $0x3c0] ss:$16 sps:$4 sm:$0xff]  }
  0xd4   : > { %1295 = vmatprep.mubr.bf16.mxu0 %v424_v43  ;;  %1521 = vmatprep.mubr.bf16.mxu1 %v424_v43  ;;  %v439_v43 = vpack.c.bf16 %v407_v38, %v403_v37  ;;  %v386_v30 = vld [vmem:[%s5263_s22 + $0x138] sm:$0xff] }
  0xd5   : > { %v4690_v37 = vld [vmem:[#allocation6 + $0xc8] ss:$16 sps:$4 sm:$0xff]  }
  0xd6   : > { %1357 = vmatpush1.bf16.msra.mxu0 %v4585_v42  ;;  %1583 = vmatpush1.bf16.msra.mxu1 %v4588_v44  ;;  %v4642_v42 = vld [vmem:[#allocation4 + $0x3c8] ss:$16 sps:$4 sm:$0xff]  }
  0xd7   : > { %1358 = vmatprep.subr.bf16.mxu0 %v4593_v47  ;;  %1584 = vmatprep.subr.bf16.mxu1 %v4596_v48  ;;  %v350_v44 = vld [vmem:[%s5263_s22 + $0x18] sm:$0xff]  ;;  %v4645_v48 = vld [vmem:[#allocation4 + $0x3e0] ss:$16 sps:$4 sm:$0xff]  }
  0xd8   : > { %v4650_v47 = vld [vmem:[#allocation4 + $0x3ec] ss:$16 sps:$4 sm:$0xff]  }
  0xd9   : > { %1296 = vmatmul.mubr.bf16.gmra.mrb[12].mxu0 %v423_v50  ;;  %1522 = vmatmul.mubr.bf16.gmra.mrb[12].mxu1 %v423_v50  ;;  %v414_v50 = vpack.c.bf16 %v354_v45, %v350_v44  ;;  %v394_v44 = vld [vmem:[%s5263_s22 + $0x178] sm:$0xff]  ;;  %v4693_v45 = vld [vmem:[#allocation6 + $0xe0] ss:$16 sps:$4 sm:$0xff]  }
  0xda   : > { %1359 = vmatpush1.bf16.msra.mxu0 %v4591_v49  ;;  %1585 = vmatpush1.bf16.msra.mxu1 %v4594_v53  ;;  %v4648_v49 = vld [vmem:[#allocation4 + $0x3e8] ss:$16 sps:$4 sm:$0xff]  }
  0xdb   : > { %1360 = vmatprep.subr.bf16.mxu0 %v4599_v54  ;;  %1586 = vmatprep.subr.bf16.mxu1 %v4602_v55  ;;  %v358_v53 = vld [vmem:[%s5263_s22 + $0x58] sm:$0xff]  ;;  %v4653_v55 = vld [vmem:[#allocation6 + $0x4] ss:$16 sps:$4 sm:$0xff]  }
  0xdc   : > { %1305 = vmatprep.mubr.bf16.mxu0 %v428_v58  ;;  %1531 = vmatprep.mubr.bf16.mxu1 %v428_v58  ;;  %v362_v54 = vld [vmem:[%s5263_s22 + $0x78] sm:$0xff] }
  0xdd   : > { %v418_v58 = vpack.c.bf16 %v362_v54, %v358_v53  ;;  %v4707_v53 = vld [vmem:[#allocation6 + $0x124] ss:$16 sps:$4 sm:$0xff]   ;;  %v4710_v54 = vld [vmem:[#allocation6 + $0x12c] ss:$16 sps:$4 sm:$0xff]  }
  0xde   : > { %1361 = vmatpush1.bf16.msra.mxu0 %v4597_v56  ;;  %1587 = vmatpush1.bf16.msra.mxu1 %v4600_v57  ;;  %v4656_v56 = vld [vmem:[#allocation6 + $0xc] ss:$16 sps:$4 sm:$0xff]   ;;  %v413_v57 = vpack.c.bf16 %v353_v52, %v349_v51  ;;  %v4702_v51 = vld [vmem:[#allocation6 + $0x108] ss:$16 sps:$4 sm:$0xff]  }
  0xdf   : > { %1362 = vmatprep.subr.bf16.mxu0 %v4605_v61  ;;  %1588 = vmatprep.subr.bf16.mxu1 %v4608_v62  ;;  %v357_v61 = vld [vmem:[%s5263_s22 + $0x50] sm:$0xff] }
  0xe0   : > { %v361_v62 = vld [vmem:[%s5263_s22 + $0x70] sm:$0xff] }
  0xe1   : > { %1306 = vmatmul.mubr.bf16.gmra.mrb[16].mxu0 %v427_v63  ;;  %1532 = vmatmul.mubr.bf16.gmra.mrb[16].mxu1 %v427_v63  ;;  %v4659_v63 = vld [vmem:[#allocation6 + $0x24] ss:$16 sps:$4 sm:$0xff]  }
  0xe2   : > { %1363 = vmatpush1.bf16.msra.mxu0 %v4603_v2  ;;  %1589 = vmatpush1.bf16.msra.mxu1 %v4606_v3  ;;  %v370_v2 = vld [vmem:[%s5263_s22 + $0xb8] sm:$0xff]  ;;  %v4657_v3 = vld [vmem:[#allocation6 + $0x20] ss:$16 sps:$4 sm:$0xff]  }
  0xe3   : > { %1364 = vmatprep.subr.bf16.mxu0 %v4611_v4  ;;  %1590 = vmatprep.subr.bf16.mxu1 %v4614_v5  ;;  %v4660_v4 = vld [vmem:[#allocation6 + $0x28] ss:$16 sps:$4 sm:$0xff]   ;;  %v4665_v5 = vld [vmem:[#allocation6 + $0x44] ss:$16 sps:$4 sm:$0xff]  }
  0xe4   : > { %1315 = vmatprep.mubr.bf16.mxu0 %v432_v6  ;;  %1541 = vmatprep.mubr.bf16.mxu1 %v432_v6  ;;  %v4668_v6 = vld [vmem:[#allocation6 + $0x4c] ss:$16 sps:$4 sm:$0xff]  }
  0xe6   : > { %1365 = vmatpush1.bf16.msra.mxu0 %v4609_v7  ;;  %1591 = vmatpush1.bf16.msra.mxu1 %v4612_v8  ;;  %v417_v7 = vpack.c.bf16 %v361_v62, %v357_v61  ;;  %v422_v8 = vpack.c.bf16 %v370_v2, %v366_v1  ;;  %v4713_v61 = vld [vmem:[#allocation6 + $0x144] ss:$16 sps:$4 sm:$0xff]   ;;  %v4716_v62 = vld [vmem:[#allocation6 + $0x14c] ss:$16 sps:$4 sm:$0xff]   ;;  %v4714_v1 = vld [vmem:[#allocation6 + $0x148] ss:$16 sps:$4 sm:$0xff]  }
  0xe7   : > { %1366 = vmatprep.subr.bf16.mxu0 %v4617_v11  ;;  %1592 = vmatprep.subr.bf16.mxu1 %v4620_v12  ;;  %v365_v11 = vld [vmem:[%s5263_s22 + $0x90] sm:$0xff] }
  0xe8   : > { %v369_v12 = vld [vmem:[%s5263_s22 + $0xb0] sm:$0xff] }
  0xe9   : > { %1316 = vmatmul.mubr.bf16.gmra.mrb[20].mxu0 %v431_v13  ;;  %1542 = vmatmul.mubr.bf16.gmra.mrb[20].mxu1 %v431_v13  ;;  %v4671_v13 = vld [vmem:[#allocation6 + $0x64] ss:$16 sps:$4 sm:$0xff]  }
  0xea   : > { %1367 = vmatpush1.bf16.msra.mxu0 %v4615_v16  ;;  %1593 = vmatpush1.bf16.msra.mxu1 %v4618_v17  ;;  %v378_v16 = vld [vmem:[%s5263_s22 + $0xf8] sm:$0xff]  ;;  %v4669_v17 = vld [vmem:[#allocation6 + $0x60] ss:$16 sps:$4 sm:$0xff]  }
  0xeb   : > { %1368 = vmatprep.subr.bf16.mxu0 %v4623_v18  ;;  %1594 = vmatprep.subr.bf16.mxu1 %v4626_v19  ;;  %v4672_v18 = vld [vmem:[#allocation6 + $0x68] ss:$16 sps:$4 sm:$0xff]   ;;  %v4677_v19 = vld [vmem:[#allocation6 + $0x84] ss:$16 sps:$4 sm:$0xff]   ;;  %v426_v24 = vpack.c.bf16 %v378_v16, %v374_v15 }
  0xec   : > { %1325 = vmatprep.mubr.bf16.mxu0 %v436_v22  ;;  %1551 = vmatprep.mubr.bf16.mxu1 %v436_v22  ;;  %v4675_v22 = vld [vmem:[#allocation6 + $0x80] ss:$16 sps:$4 sm:$0xff]   ;;  %v4726_v15 = vld [vmem:[#allocation6 + $0x188] ss:$16 sps:$4 sm:$0xff]  }
  0xee   : > { %1369 = vmatpush1.bf16.msra.mxu0 %v4621_v20  ;;  %1595 = vmatpush1.bf16.msra.mxu1 %v4624_v21  ;;  %v4680_v20 = vld [vmem:[#allocation6 + $0x8c] ss:$16 sps:$4 sm:$0xff]   ;;  %v421_v21 = vpack.c.bf16 %v369_v12, %v365_v11  ;;  %v4725_v11 = vld [vmem:[#allocation6 + $0x184] ss:$16 sps:$4 sm:$0xff]  }
  0xef   : > { %1370 = vmatprep.subr.bf16.mxu0 %v4629_v25  ;;  %1596 = vmatprep.subr.bf16.mxu1 %v4632_v26  ;;  %v4683_v25 = vld [vmem:[#allocation6 + $0xa4] ss:$16 sps:$4 sm:$0xff]   ;;  %v4686_v26 = vld [vmem:[#allocation6 + $0xac] ss:$16 sps:$4 sm:$0xff]  }
  0xf0   : > { %v4728_v12 = vld [vmem:[#allocation6 + $0x18c] ss:$16 sps:$4 sm:$0xff]  }
  0xf1   : > { %1326 = vmatmul.mubr.bf16.gmra.mrb[24].mxu0 %v435_v29  ;;  %1552 = vmatmul.mubr.bf16.gmra.mrb[24].mxu1 %v435_v29  ;;  %v382_v29 = vld [vmem:[%s5263_s22 + $0x118] sm:$0xff] }
  0xf2   : > { %1371 = vmatpush1.bf16.msra.mxu0 %v4627_v27  ;;  %1597 = vmatpush1.bf16.msra.mxu1 %v4630_v28  ;;  %v373_v27 = vld [vmem:[%s5263_s22 + $0xd0] sm:$0xff]  ;;  %v430_v38 = vpack.c.bf16 %v386_v30, %v382_v29  ;;  %v4746_v29 = vld [vmem:[#allocation6 + $0x1ec] ss:$16 sps:$4 sm:$0xff]  }
  0xf3   : > { %1372 = vmatprep.subr.bf16.mxu0 %v4635_v32  ;;  %1598 = vmatprep.subr.bf16.mxu1 %v4638_v33  ;;  %v377_v28 = vld [vmem:[%s5263_s22 + $0xf0] sm:$0xff]  ;;  %v4684_v32 = vld [vmem:[#allocation6 + $0xa8] ss:$16 sps:$4 sm:$0xff]  }
  0xf4   : > { %1335 = vmatprep.mubr.bf16.mxu0 %v440_v36  ;;  %1561 = vmatprep.mubr.bf16.mxu1 %v440_v36  ;;  %v4689_v33 = vld [vmem:[#allocation6 + $0xc4] ss:$16 sps:$4 sm:$0xff]   ;;  %v4687_v36 = vld [vmem:[#allocation6 + $0xc0] ss:$16 sps:$4 sm:$0xff]  }
  0xf5   : > { %v4741_v30 = vld [vmem:[#allocation6 + $0x1e0] ss:$16 sps:$4 sm:$0xff]  }
  0xf6   : > { %1373 = vmatpush1.bf16.msra.mxu0 %v4633_v34  ;;  %1599 = vmatpush1.bf16.msra.mxu1 %v4636_v35  ;;  %v4692_v34 = vld [vmem:[#allocation6 + $0xcc] ss:$16 sps:$4 sm:$0xff]   ;;  %v425_v35 = vpack.c.bf16 %v377_v28, %v373_v27  ;;  %v4738_v27 = vld [vmem:[#allocation6 + $0x1c8] ss:$16 sps:$4 sm:$0xff]   ;;  %v4743_v28 = vld [vmem:[#allocation6 + $0x1e4] ss:$16 sps:$4 sm:$0xff]  }
  0xf7   : > { %1374 = vmatprep.subr.bf16.mxu0 %v4641_v39  ;;  %1600 = vmatprep.subr.bf16.mxu1 %v4644_v40  ;;  %v4695_v39 = vld [vmem:[#allocation6 + $0xe4] ss:$16 sps:$4 sm:$0xff]   ;;  %v4698_v40 = vld [vmem:[#allocation6 + $0xec] ss:$16 sps:$4 sm:$0xff]  }
  0xf9   : > { %1336 = vmatmul.mubr.bf16.gmra.mrb[28].mxu0 %v439_v43  ;;  %1562 = vmatmul.mubr.bf16.gmra.mrb[28].mxu1 %v439_v43  ;;  %v390_v43 = vld [vmem:[%s5263_s22 + $0x158] sm:$0xff] }
  0xfa   : > { %1375 = vmatpush1.bf16.msra.mxu0 %v4639_v41  ;;  %1601 = vmatpush1.bf16.msra.mxu1 %v4642_v42  ;;  %v381_v41 = vld [vmem:[%s5263_s22 + $0x110] sm:$0xff]  ;;  %v434_v52 = vpack.c.bf16 %v394_v44, %v390_v43 }
  0xfb   : > { %1376 = vmatprep.subr.bf16.mxu0 %v4647_v46  ;;  %1602 = vmatprep.subr.bf16.mxu1 %v4650_v47  ;;  %v385_v42 = vld [vmem:[%s5263_s22 + $0x130] sm:$0xff]  ;;  %v4696_v46 = vld [vmem:[#allocation6 + $0xe8] ss:$16 sps:$4 sm:$0xff]  }
  0xfc   : > { %1378 = vmatprep.mubr.bf16.mxu0 %v414_v50  ;;  %1604 = vmatprep.mubr.bf16.mxu1 %v414_v50  ;;  %v4701_v47 = vld [vmem:[#allocation6 + $0x104] ss:$16 sps:$4 sm:$0xff]   ;;  %v4699_v50 = vld [vmem:[#allocation6 + $0x100] ss:$16 sps:$4 sm:$0xff]  }
  0xfe   : > { %1377 = vmatpush1.bf16.msra.mxu0 %v4645_v48  ;;  %1603 = vmatpush1.bf16.msra.mxu1 %v4648_v49  ;;  %v4704_v48 = vld [vmem:[#allocation6 + $0x10c] ss:$16 sps:$4 sm:$0xff]   ;;  %v429_v49 = vpack.c.bf16 %v385_v42, %v381_v41 }
  0xff   : > { %2571 = vmatprep.subr.bf16.mxu0 %v4653_v55  ;;  %2797 = vmatprep.subr.bf16.mxu1 %v4656_v56  ;;  %v389_v55 = vld [vmem:[%s5263_s22 + $0x150] sm:$0xff] }
 0x100   : > { %v393_v56 = vld [vmem:[%s5263_s22 + $0x170] sm:$0xff] }
 0x101   : > { %1379 = vmatmul.mubr.bf16.vlgmr.msra.gmra.mrb[0].mxu0 %v413_v57  ;;  %1605 = vmatmul.mubr.bf16.vlgmr.msra.gmra.mrb[0].mxu1 %v413_v57  ;;  %v398_v57 = vld [vmem:[%s5263_s22 + $0x198] sm:$0xff] }
 0x102   : > { %1388 = vmatprep.mubr.bf16.mxu0 %v418_v58  ;;  %1614 = vmatprep.mubr.bf16.mxu1 %v418_v58  ;;  %v402_v58 = vld [vmem:[%s5263_s22 + $0x1b8] sm:$0xff] }
 0x103   : > { %2572 = vmatpush1.bf16.msra.mxu0 %v4651_v59  ;;  %2798 = vmatpush1.bf16.msra.mxu1 %v4654_v60  ;;  %v4705_v59 = vld [vmem:[#allocation6 + $0x120] ss:$16 sps:$4 sm:$0xff]   ;;  %v4708_v60 = vld [vmem:[#allocation6 + $0x128] ss:$16 sps:$4 sm:$0xff]   ;;  %v438_v2 = vpack.c.bf16 %v402_v58, %v398_v57 }
 0x104   : > { %2573 = vmatprep.subr.bf16.mxu0 %v4659_v63  ;;  %2799 = vmatprep.subr.bf16.mxu1 %v4662_v0  ;;  %v433_v63 = vpack.c.bf16 %v393_v56, %v389_v55  ;;  %v4711_v0 = vld [vmem:[#allocation6 + $0x140] ss:$16 sps:$4 sm:$0xff]  }
 0x107   : > { %2574 = vmatpush1.bf16.msra.mxu0 %v4657_v3  ;;  %2800 = vmatpush1.bf16.msra.mxu1 %v4660_v4  ;;  %v4719_v3 = vld [vmem:[#allocation6 + $0x164] ss:$16 sps:$4 sm:$0xff]   ;;  %v4722_v4 = vld [vmem:[#allocation6 + $0x16c] ss:$16 sps:$4 sm:$0xff]  }
 0x108   : > { %2575 = vmatprep.subr.bf16.mxu0 %v4665_v5  ;;  %2801 = vmatprep.subr.bf16.mxu1 %v4668_v6  ;;  %v397_v5 = vld [vmem:[%s5263_s22 + $0x190] sm:$0xff] }
 0x109   : > { %1389 = vmatmul.mubr.bf16.gmra.mrb[4].mxu0 %v417_v7  ;;  %1615 = vmatmul.mubr.bf16.gmra.mrb[4].mxu1 %v417_v7  ;;  %v401_v6 = vld [vmem:[%s5263_s22 + $0x1b0] sm:$0xff]  ;;  %v406_v7 = vld [vmem:[%s5263_s22 + $0x1d8] sm:$0xff] }
 0x10a   : > { %1398 = vmatprep.mubr.bf16.mxu0 %v422_v8  ;;  %1624 = vmatprep.mubr.bf16.mxu1 %v422_v8  ;;  %v410_v8 = vld [vmem:[%s5263_s22 + $0x1f8] sm:$0xff] }
 0x10b   : > { %2576 = vmatpush1.bf16.msra.mxu0 %v4663_v9  ;;  %2802 = vmatpush1.bf16.msra.mxu1 %v4666_v10  ;;  %v4717_v9 = vld [vmem:[#allocation6 + $0x160] ss:$16 sps:$4 sm:$0xff]   ;;  %v4720_v10 = vld [vmem:[#allocation6 + $0x168] ss:$16 sps:$4 sm:$0xff]   ;;  %v442_v16 = vpack.c.bf16 %v410_v8, %v406_v7 }
 0x10c   : > { %2577 = vmatprep.subr.bf16.mxu0 %v4671_v13  ;;  %2803 = vmatprep.subr.bf16.mxu1 %v4674_v14  ;;  %v437_v13 = vpack.c.bf16 %v401_v6, %v397_v5  ;;  %v4723_v14 = vld [vmem:[#allocation6 + $0x180] ss:$16 sps:$4 sm:$0xff]  }
 0x10f   : > { %2578 = vmatpush1.bf16.msra.mxu0 %v4669_v17  ;;  %2804 = vmatpush1.bf16.msra.mxu1 %v4672_v18  ;;  %v4731_v17 = vld [vmem:[#allocation6 + $0x1a4] ss:$16 sps:$4 sm:$0xff]   ;;  %v4734_v18 = vld [vmem:[#allocation6 + $0x1ac] ss:$16 sps:$4 sm:$0xff]  }
 0x110   : > { %2579 = vmatprep.subr.bf16.mxu0 %v4677_v19  ;;  %2805 = vmatprep.subr.bf16.mxu1 %v4680_v20  ;;  %v405_v19 = vld [vmem:[%s5263_s22 + $0x1d0] sm:$0xff] }
 0x111   : > { %1399 = vmatmul.mubr.bf16.gmra.mrb[8].mxu0 %v421_v21  ;;  %1625 = vmatmul.mubr.bf16.gmra.mrb[8].mxu1 %v421_v21  ;;  %v409_v20 = vld [vmem:[%s5263_s22 + $0x1f0] sm:$0xff] }
 0x112   : > { %1408 = vmatprep.mubr.bf16.mxu0 %v426_v24  ;;  %1634 = vmatprep.mubr.bf16.mxu1 %v426_v24  ;;  %v4729_v21 = vld [vmem:[#allocation6 + $0x1a0] ss:$16 sps:$4 sm:$0xff]   ;;  %v4737_v24 = vld [vmem:[#allocation6 + $0x1c4] ss:$16 sps:$4 sm:$0xff]  }
 0x113   : > { %2580 = vmatpush1.bf16.msra.mxu0 %v4675_v22  ;;  %2806 = vmatpush1.bf16.msra.mxu1 %v4678_v23  ;;  %v4732_v22 = vld [vmem:[#allocation6 + $0x1a8] ss:$16 sps:$4 sm:$0xff]   ;;  %v441_v23 = vpack.c.bf16 %v409_v20, %v405_v19 }
 0x114   : > { %2581 = vmatprep.subr.bf16.mxu0 %v4683_v25  ;;  %2807 = vmatprep.subr.bf16.mxu1 %v4686_v26  ;;  %v4740_v25 = vld [vmem:[#allocation6 + $0x1cc] ss:$16 sps:$4 sm:$0xff]   ;;  %v4735_v26 = vld [vmem:[#allocation6 + $0x1c0] ss:$16 sps:$4 sm:$0xff]  }
 0x117   : > { %2582 = vmatpush1.bf16.msra.mxu0 %v4681_v31  ;;  %2808 = vmatpush1.bf16.msra.mxu1 %v4684_v32  ;;  %v4744_v31 = vld [vmem:[#allocation6 + $0x1e8] ss:$16 sps:$4 sm:$0xff]   ;;  %v4749_v32 = vld [vmem:[#allocation6 + $0x204] ss:$16 sps:$4 sm:$0xff]  }
 0x118   : > { %2583 = vmatprep.subr.bf16.mxu0 %v4689_v33  ;;  %2809 = vmatprep.subr.bf16.mxu1 %v4692_v34  ;;  %v4752_v33 = vld [vmem:[#allocation6 + $0x20c] ss:$16 sps:$4 sm:$0xff]   ;;  %v573_v34 = vlaneseq }
 0x119   : > { %1409 = vmatmul.mubr.bf16.gmra.mrb[12].mxu0 %v425_v35  ;;  %1635 = vmatmul.mubr.bf16.gmra.mrb[12].mxu1 %v425_v35 }
 0x11a   : > { %1418 = vmatprep.mubr.bf16.mxu0 %v430_v38  ;;  %1644 = vmatprep.mubr.bf16.mxu1 %v430_v38  ;;  %v5341_v35 = vshrl.u32 %v573_v34, 7  ;;  %v571_v38 = vld [vmem:[%s5636_s2] sm:$0xf] }
 0x11b   : > { %2584 = vmatpush1.bf16.msra.mxu0 %v4687_v36  ;;  %2810 = vmatpush1.bf16.msra.mxu1 %v4690_v37 }
 0x11c   : > { %2585 = vmatprep.subr.bf16.mxu0 %v4695_v39  ;;  %2811 = vmatprep.subr.bf16.mxu1 %v4698_v40  ;;  %v575_v36 = vsub.s32 0, %v5341_v35  ;;  %v583_v37 = vsub.s32 2, %v5341_v35  ;;  %v579_v39 = vsub.s32 1, %v5341_v35  ;;  %v587_v40 = vsub.s32 3, %v5341_v35 }
 0x11e   : > { %v5352_v41 = vrot.slane %v571_v38, %v575_v36  ;;  %v5356_v42 = vrot.slane %v571_v38, %v583_v37  ;;  %v5360_v43 = vrot.slane %v571_v38, %v579_v39  ;;  %v5364_v44 = vrot.slane %v571_v38, %v587_v40 }
 0x11f   : > { %2586 = vmatpush1.bf16.msra.mxu0 %v4693_v45  ;;  %2812 = vmatpush1.bf16.msra.mxu1 %v4696_v46 }
 0x120   : > { %2587 = vmatprep.subr.bf16.mxu0 %v4701_v47  ;;  %2813 = vmatprep.subr.bf16.mxu1 %v4704_v48 }
 0x121   : > { %1419 = vmatmul.mubr.bf16.gmra.mrb[16].mxu0 %v429_v49  ;;  %1645 = vmatmul.mubr.bf16.gmra.mrb[16].mxu1 %v429_v49 }
 0x122   : > { %1428 = vmatprep.mubr.bf16.mxu0 %v434_v52  ;;  %1654 = vmatprep.mubr.bf16.mxu1 %v434_v52 }
 0x123   : > { %2588 = vmatpush1.bf16.msra.mxu0 %v4699_v50  ;;  %2814 = vmatpush1.bf16.msra.mxu1 %v4702_v51 }
 0x124   : > { %2589 = vmatprep.subr.bf16.mxu0 %v4707_v53  ;;  %2815 = vmatprep.subr.bf16.mxu1 %v4710_v54 }
 0x127   : > { %2590 = vmatpush1.bf16.msra.mxu0 %v4705_v59  ;;  %2816 = vmatpush1.bf16.msra.mxu1 %v4708_v60 }
 0x128   : > { %2591 = vmatprep.subr.bf16.mxu0 %v4713_v61  ;;  %2817 = vmatprep.subr.bf16.mxu1 %v4716_v62 }
 0x129   : > { %1429 = vmatmul.mubr.bf16.gmra.mrb[20].mxu0 %v433_v63  ;;  %1655 = vmatmul.mubr.bf16.gmra.mrb[20].mxu1 %v433_v63 }
 0x12a   : > { %1438 = vmatprep.mubr.bf16.mxu0 %v438_v2  ;;  %1664 = vmatprep.mubr.bf16.mxu1 %v438_v2 }
 0x12b   : > { %2592 = vmatpush1.bf16.msra.mxu0 %v4711_v0  ;;  %2818 = vmatpush1.bf16.msra.mxu1 %v4714_v1 }
 0x12c   : > { %2593 = vmatprep.subr.bf16.mxu0 %v4719_v3  ;;  %2819 = vmatprep.subr.bf16.mxu1 %v4722_v4 }
 0x12f   : > { %2594 = vmatpush1.bf16.msra.mxu0 %v4717_v9  ;;  %2820 = vmatpush1.bf16.msra.mxu1 %v4720_v10 }
 0x130   : > { %2595 = vmatprep.subr.bf16.mxu0 %v4725_v11  ;;  %2821 = vmatprep.subr.bf16.mxu1 %v4728_v12  ;;  %v4747_v11 = vld [vmem:[#allocation6 + $0x200] ss:$16 sps:$4 sm:$0xff]   ;;  %v4750_v12 = vld [vmem:[#allocation6 + $0x208] ss:$16 sps:$4 sm:$0xff]  }
 0x131   : > { %1439 = vmatmul.mubr.bf16.gmra.mrb[24].mxu0 %v437_v13  ;;  %1665 = vmatmul.mubr.bf16.gmra.mrb[24].mxu1 %v437_v13 }
 0x132   : > { %1448 = vmatprep.mubr.bf16.mxu0 %v442_v16  ;;  %1674 = vmatprep.mubr.bf16.mxu1 %v442_v16 }
 0x133   : > { %2596 = vmatpush1.bf16.msra.mxu0 %v4723_v14  ;;  %2822 = vmatpush1.bf16.msra.mxu1 %v4726_v15 }
 0x134   : > { %2597 = vmatprep.subr.bf16.mxu0 %v4731_v17  ;;  %2823 = vmatprep.subr.bf16.mxu1 %v4734_v18  ;;  %v4755_v17 = vld [vmem:[#allocation6 + $0x224] ss:$16 sps:$4 sm:$0xff]   ;;  %v4758_v18 = vld [vmem:[#allocation6 + $0x22c] ss:$16 sps:$4 sm:$0xff]  }
 0x137   : > { %2598 = vmatpush1.bf16.msra.mxu0 %v4729_v21  ;;  %2824 = vmatpush1.bf16.msra.mxu1 %v4732_v22 }
 0x138   : > { %2599 = vmatprep.subr.bf16.mxu0 %v4737_v24  ;;  %2825 = vmatprep.subr.bf16.mxu1 %v4740_v25 }
 0x139   : > { %1449 = vmatmul.mubr.bf16.gmra.mrb[28].mxu0 %v441_v23  ;;  %1675 = vmatmul.mubr.bf16.gmra.mrb[28].mxu1 %v441_v23 }
 0x13b   : > { %2600 = vmatpush1.bf16.msra.mxu0 %v4735_v26  ;;  %2826 = vmatpush1.bf16.msra.mxu1 %v4738_v27 }
 0x13c   : > { %2601 = vmatprep.subr.bf16.mxu0 %v4743_v28  ;;  %2827 = vmatprep.subr.bf16.mxu1 %v4746_v29  ;;  %v4753_v29 = vld [vmem:[#allocation6 + $0x220] ss:$16 sps:$4 sm:$0xff]  }
 0x13f   : > { %2602 = vmatpush1.bf16.msra.mxu0 %v4741_v30  ;;  %2828 = vmatpush1.bf16.msra.mxu1 %v4744_v31  ;;  %v4756_v30 = vld [vmem:[#allocation6 + $0x228] ss:$16 sps:$4 sm:$0xff]   ;;  %v4761_v31 = vld [vmem:[#allocation6 + $0x244] ss:$16 sps:$4 sm:$0xff]  }
 0x140   : > { %2684 = vmatprep.subr.bf16.mxu0 %v4749_v32  ;;  %2910 = vmatprep.subr.bf16.mxu1 %v4752_v33 }
 0x1d4   : > { %v1380_v45 = vpop.f32.mrb[0].mxu0  ;;  %v1606_v46 = vpop.f32.mrb[0].mxu1 }
 0x1d5   : > { %v4127_v47 = vadd.f32 %v1380_v45, %v5352_v41  ;;  %v4159_v48 = vadd.f32 %v1606_v46, %v5356_v42  ;;  %v1382_v49 = vpop.f32.mrb[1].mxu0  ;;  %v1608_v50 = vpop.f32.mrb[1].mxu1  ;;  %v4764_v45 = vld [vmem:[#allocation6 + $0x24c] ss:$16 sps:$4 sm:$0xff]  }
 0x1d6   : > { %v4128_v51 = vadd.f32 %v1382_v49, %v5360_v43  ;;  %v4160_v52 = vadd.f32 %v1608_v50, %v5364_v44  ;;  %v1384_v53 = vpop.f32.mrb[2].mxu0  ;;  %v1610_v54 = vpop.f32.mrb[2].mxu1 }
 0x1d7   : > { %v4129_v55 = vadd.f32 %v1384_v53, %v5352_v41  ;;  %v4161_v56 = vadd.f32 %v1610_v54, %v5356_v42  ;;  %v1386_v57 = vpop.f32.mrb[3].mxu0  ;;  %v1612_v58 = vpop.f32.mrb[3].mxu1  ;;  %v1685_v61 = vmax.f32 %v4127_v47, 0.0  ;;  %v1687_v62 = vmax.f32 %v4159_v48, 0.0 }
 0x1d8   : > { %v4130_v59 = vadd.f32 %v1386_v57, %v5360_v43  ;;  %v4162_v60 = vadd.f32 %v1612_v58, %v5364_v44  ;;  %v1686_v1 = vmax.f32 %v4128_v51, 0.0  ;;  %v1688_v2 = vmax.f32 %v4160_v52, 0.0  ;;  %v4762_v57 = vld [vmem:[#allocation6 + $0x248] ss:$16 sps:$4 sm:$0xff]  }
 0x1d9   : > { %v1689_v63 = vmax.f32 %v4129_v55, 0.0  ;;  %v1691_v0 = vmax.f32 %v4161_v56, 0.0  ;;  %v4759_v56 = vld [vmem:[#allocation6 + $0x240] ss:$16 sps:$4 sm:$0xff]  }
 0x1da   : > { %v1690_v3 = vmax.f32 %v4130_v59, 0.0  ;;  %v1692_v4 = vmax.f32 %v4162_v60, 0.0 }
 0x1db   : > { %v1749_v5 = vpack.c.bf16 %v1689_v63, %v1685_v61  ;;  %v5374_v6 = vpack.c.bf16 %v1691_v0, %v1687_v62  ;;  %v4767_v62 = vld [vmem:[#allocation6 + $0x264] ss:$16 sps:$4 sm:$0xff]   ;;  %v4770_v63 = vld [vmem:[#allocation6 + $0x26c] ss:$16 sps:$4 sm:$0xff]  }
 0x1dc   : > { %v1750_v7 = vpack.c.bf16 %v1690_v3, %v1686_v1  ;;  %v5376_v8 = vpack.c.bf16 %v1692_v4, %v1688_v2  ;;  %v1390_v9 = vpop.f32.mrb[4].mxu0  ;;  %v1616_v10 = vpop.f32.mrb[4].mxu1 }
 0x1dd   : > { %v4131_v13 = vadd.f32 %v1390_v9, %v5352_v41  ;;  %v4163_v14 = vadd.f32 %v1616_v10, %v5356_v42  ;;  %v1392_v15 = vpop.f32.mrb[5].mxu0  ;;  %v1618_v16 = vpop.f32.mrb[5].mxu1 }
 0x1de   : > { %v4132_v19 = vadd.f32 %v1392_v15, %v5360_v43  ;;  %v4164_v20 = vadd.f32 %v1618_v16, %v5364_v44  ;;  %v1394_v21 = vpop.f32.mrb[6].mxu0  ;;  %v1620_v22 = vpop.f32.mrb[6].mxu1  ;;  %2603 = vmatprep.mubr.bf16.mxu0 %v1750_v7  ;;  %2829 = vmatprep.mubr.bf16.mxu1 %v1750_v7 }
 0x1df   : > { %v4133_v23 = vadd.f32 %v1394_v21, %v5352_v41  ;;  %v4165_v24 = vadd.f32 %v1620_v22, %v5356_v42  ;;  %v1396_v25 = vpop.f32.mrb[7].mxu0  ;;  %v1622_v26 = vpop.f32.mrb[7].mxu1  ;;  %2604 = vmatmul.mubr.bf16.vlgmr.msra.gmra.mrb[32].mxu0 %v1749_v5  ;;  %2830 = vmatmul.mubr.bf16.vlgmr.msra.gmra.mrb[32].mxu1 %v1749_v5  ;;  %v1693_v32 = vmax.f32 %v4131_v13, 0.0  ;;  %v1695_v33 = vmax.f32 %v4163_v14, 0.0  ;;  %v4768_v13 = vld [vmem:[#allocation6 + $0x268] ss:$16 sps:$4 sm:$0xff]  }
 0x1e0   : > { %v4134_v27 = vadd.f32 %v1396_v25, %v5360_v43  ;;  %v4166_v28 = vadd.f32 %v1622_v26, %v5364_v44  ;;  %2685 = vmatpush1.bf16.msra.mxu0 %v4747_v11  ;;  %2911 = vmatpush1.bf16.msra.mxu1 %v4750_v12  ;;  %v1694_v46 = vmax.f32 %v4132_v19, 0.0  ;;  %v1696_v47 = vmax.f32 %v4164_v20, 0.0  ;;  %v4765_v12 = vld [vmem:[#allocation6 + $0x260] ss:$16 sps:$4 sm:$0xff]   ;;  %v4773_v14 = vld [vmem:[#allocation6 + $0x284] ss:$16 sps:$4 sm:$0xff]  }
 0x1e1   : > { %v1697_v34 = vmax.f32 %v4133_v23, 0.0  ;;  %v1699_v38 = vmax.f32 %v4165_v24, 0.0  ;;  %2686 = vmatprep.subr.bf16.mxu0 %v4755_v17  ;;  %2912 = vmatprep.subr.bf16.mxu1 %v4758_v18  ;;  %v4776_v19 = vld [vmem:[#allocation6 + $0x28c] ss:$16 sps:$4 sm:$0xff]  }
 0x1e2   : > { %v1698_v48 = vmax.f32 %v4134_v27, 0.0  ;;  %v1700_v49 = vmax.f32 %v4166_v28, 0.0 }
 0x1e3   : > { %v1753_v50 = vpack.c.bf16 %v1697_v34, %v1693_v32  ;;  %v5386_v51 = vpack.c.bf16 %v1699_v38, %v1695_v33 }
 0x1e4   : > { %v1754_v52 = vpack.c.bf16 %v1698_v48, %v1694_v46  ;;  %v5388_v53 = vpack.c.bf16 %v1700_v49, %v1696_v47  ;;  %v1400_v54 = vpop.f32.mrb[8].mxu0  ;;  %v1626_v55 = vpop.f32.mrb[8].mxu1  ;;  %2687 = vmatpush1.bf16.msra.mxu0 %v4753_v29  ;;  %2913 = vmatpush1.bf16.msra.mxu1 %v4756_v30  ;;  %v4771_v30 = vld [vmem:[#allocation6 + $0x280] ss:$16 sps:$4 sm:$0xff]   ;;  %v4782_v46 = vld [vmem:[#allocation6 + $0x2ac] ss:$16 sps:$4 sm:$0xff]  }
 0x1e5   : > { %v4135_v58 = vadd.f32 %v1400_v54, %v5352_v41  ;;  %v4167_v59 = vadd.f32 %v1626_v55, %v5356_v42  ;;  %v1402_v60 = vpop.f32.mrb[9].mxu0  ;;  %v1628_v61 = vpop.f32.mrb[9].mxu1  ;;  %2688 = vmatprep.subr.bf16.mxu0 %v4761_v31  ;;  %2914 = vmatprep.subr.bf16.mxu1 %v4764_v45  ;;  %v4774_v31 = vld [vmem:[#allocation6 + $0x288] ss:$16 sps:$4 sm:$0xff]   ;;  %v4779_v45 = vld [vmem:[#allocation6 + $0x2a4] ss:$16 sps:$4 sm:$0xff]  }
 0x1e6   : > { %v4136_v0 = vadd.f32 %v1402_v60, %v5360_v43  ;;  %v4168_v1 = vadd.f32 %v1628_v61, %v5364_v44  ;;  %v1404_v2 = vpop.f32.mrb[10].mxu0  ;;  %v1630_v3 = vpop.f32.mrb[10].mxu1  ;;  %2613 = vmatprep.mubr.bf16.mxu0 %v1754_v52  ;;  %2839 = vmatprep.mubr.bf16.mxu1 %v1754_v52  ;;  %v4780_v60 = vld [vmem:[#allocation6 + $0x2a8] ss:$16 sps:$4 sm:$0xff]   ;;  %v4785_v61 = vld [vmem:[#allocation6 + $0x2c4] ss:$16 sps:$4 sm:$0xff]  }
 0x1e7   : > { %v4137_v4 = vadd.f32 %v1404_v2, %v5352_v41  ;;  %v4169_v5 = vadd.f32 %v1630_v3, %v5356_v42  ;;  %v1406_v7 = vpop.f32.mrb[11].mxu0  ;;  %v1632_v9 = vpop.f32.mrb[11].mxu1  ;;  %2614 = vmatmul.mubr.bf16.gmra.mrb[36].mxu0 %v1753_v50  ;;  %2840 = vmatmul.mubr.bf16.gmra.mrb[36].mxu1 %v1753_v50  ;;  %v1701_v15 = vmax.f32 %v4135_v58, 0.0  ;;  %v1703_v16 = vmax.f32 %v4167_v59, 0.0  ;;  %v4777_v59 = vld [vmem:[#allocation6 + $0x2a0] ss:$16 sps:$4 sm:$0xff]  }
 0x1e8   : > { %v4138_v10 = vadd.f32 %v1406_v7, %v5360_v43  ;;  %v4170_v11 = vadd.f32 %v1632_v9, %v5364_v44  ;;  %2689 = vmatpush1.bf16.msra.mxu0 %v4759_v56  ;;  %2915 = vmatpush1.bf16.msra.mxu1 %v4762_v57  ;;  %v1702_v20 = vmax.f32 %v4136_v0, 0.0  ;;  %v1704_v21 = vmax.f32 %v4168_v1, 0.0  ;;  %v4788_v2 = vld [vmem:[#allocation6 + $0x2cc] ss:$16 sps:$4 sm:$0xff]  }
 0x1e9   : > { %v1705_v17 = vmax.f32 %v4137_v4, 0.0  ;;  %v1707_v18 = vmax.f32 %v4169_v5, 0.0  ;;  %2690 = vmatprep.subr.bf16.mxu0 %v4767_v62  ;;  %2916 = vmatprep.subr.bf16.mxu1 %v4770_v63 }
 0x1ea   : > { %v1706_v22 = vmax.f32 %v4138_v10, 0.0  ;;  %v1708_v23 = vmax.f32 %v4170_v11, 0.0 }
 0x1eb   : > { %v1757_v24 = vpack.c.bf16 %v1705_v17, %v1701_v15  ;;  %v5398_v25 = vpack.c.bf16 %v1707_v18, %v1703_v16  ;;  %v4783_v15 = vld [vmem:[#allocation6 + $0x2c0] ss:$16 sps:$4 sm:$0xff]   ;;  %v4786_v16 = vld [vmem:[#allocation6 + $0x2c8] ss:$16 sps:$4 sm:$0xff]  }
 0x1ec   : > { %v1758_v26 = vpack.c.bf16 %v1706_v22, %v1702_v20  ;;  %v5400_v27 = vpack.c.bf16 %v1708_v23, %v1704_v21  ;;  %v1410_v28 = vpop.f32.mrb[12].mxu0  ;;  %v1636_v29 = vpop.f32.mrb[12].mxu1  ;;  %2691 = vmatpush1.bf16.msra.mxu0 %v4765_v12  ;;  %2917 = vmatpush1.bf16.msra.mxu1 %v4768_v13  ;;  %v4791_v21 = vld [vmem:[#allocation6 + $0x2e4] ss:$16 sps:$4 sm:$0xff]   ;;  %v4794_v22 = vld [vmem:[#allocation6 + $0x2ec] ss:$16 sps:$4 sm:$0xff]  }
 0x1ed   : > { %v4139_v32 = vadd.f32 %v1410_v28, %v5352_v41  ;;  %v4171_v33 = vadd.f32 %v1636_v29, %v5356_v42  ;;  %v1412_v34 = vpop.f32.mrb[13].mxu0  ;;  %v1638_v38 = vpop.f32.mrb[13].mxu1  ;;  %2692 = vmatprep.subr.bf16.mxu0 %v4773_v14  ;;  %2918 = vmatprep.subr.bf16.mxu1 %v4776_v19 }
 0x1ee   : > { %v4140_v47 = vadd.f32 %v1412_v34, %v5360_v43  ;;  %v4172_v48 = vadd.f32 %v1638_v38, %v5364_v44  ;;  %v1414_v49 = vpop.f32.mrb[14].mxu0  ;;  %v1640_v50 = vpop.f32.mrb[14].mxu1  ;;  %2623 = vmatprep.mubr.bf16.mxu0 %v1758_v26  ;;  %2849 = vmatprep.mubr.bf16.mxu1 %v1758_v26  ;;  %v4789_v38 = vld [vmem:[#allocation6 + $0x2e0] ss:$16 sps:$4 sm:$0xff]  }
 0x1ef   : > { %v4141_v52 = vadd.f32 %v1414_v49, %v5352_v41  ;;  %v4173_v54 = vadd.f32 %v1640_v50, %v5356_v42  ;;  %v1416_v55 = vpop.f32.mrb[15].mxu0  ;;  %v1642_v56 = vpop.f32.mrb[15].mxu1  ;;  %2624 = vmatmul.mubr.bf16.gmra.mrb[40].mxu0 %v1757_v24  ;;  %2850 = vmatmul.mubr.bf16.gmra.mrb[40].mxu1 %v1757_v24  ;;  %v1709_v62 = vmax.f32 %v4139_v32, 0.0  ;;  %v1711_v63 = vmax.f32 %v4171_v33, 0.0 }
 0x1f0   : > { %v4142_v57 = vadd.f32 %v1416_v55, %v5360_v43  ;;  %v4174_v58 = vadd.f32 %v1642_v56, %v5364_v44  ;;  %2693 = vmatpush1.bf16.msra.mxu0 %v4771_v30  ;;  %2919 = vmatpush1.bf16.msra.mxu1 %v4774_v31  ;;  %v1710_v3 = vmax.f32 %v4140_v47, 0.0  ;;  %v1712_v4 = vmax.f32 %v4172_v48, 0.0 }
 0x1f1   : > { %v1713_v0 = vmax.f32 %v4141_v52, 0.0  ;;  %v1715_v1 = vmax.f32 %v4173_v54, 0.0  ;;  %2694 = vmatprep.subr.bf16.mxu0 %v4779_v45  ;;  %2920 = vmatprep.subr.bf16.mxu1 %v4782_v46  ;;  %v4792_v45 = vld [vmem:[#allocation6 + $0x2e8] ss:$16 sps:$4 sm:$0xff]   ;;  %v4797_v46 = vld [vmem:[#allocation6 + $0x304] ss:$16 sps:$4 sm:$0xff]  }
 0x1f2   : > { %v1714_v5 = vmax.f32 %v4142_v57, 0.0  ;;  %v1716_v7 = vmax.f32 %v4174_v58, 0.0  ;;  %v4800_v52 = vld [vmem:[#allocation6 + $0x30c] ss:$16 sps:$4 sm:$0xff]  }
 0x1f3   : > { %v1761_v9 = vpack.c.bf16 %v1713_v0, %v1709_v62  ;;  %v5410_v10 = vpack.c.bf16 %v1715_v1, %v1711_v63  ;;  %v4795_v0 = vld [vmem:[#allocation6 + $0x300] ss:$16 sps:$4 sm:$0xff]   ;;  %v4798_v1 = vld [vmem:[#allocation6 + $0x308] ss:$16 sps:$4 sm:$0xff]  }
 0x1f4   : > { %v1762_v11 = vpack.c.bf16 %v1714_v5, %v1710_v3  ;;  %v5412_v12 = vpack.c.bf16 %v1716_v7, %v1712_v4  ;;  %v1420_v13 = vpop.f32.mrb[16].mxu0  ;;  %v1646_v14 = vpop.f32.mrb[16].mxu1  ;;  %2695 = vmatpush1.bf16.msra.mxu0 %v4777_v59  ;;  %2921 = vmatpush1.bf16.msra.mxu1 %v4780_v60  ;;  %v4803_v7 = vld [vmem:[#allocation6 + $0x324] ss:$16 sps:$4 sm:$0xff]  }
 0x1f5   : > { %v4143_v17 = vadd.f32 %v1420_v13, %v5352_v41  ;;  %v4175_v18 = vadd.f32 %v1646_v14, %v5356_v42  ;;  %v1422_v19 = vpop.f32.mrb[17].mxu0  ;;  %v1648_v20 = vpop.f32.mrb[17].mxu1  ;;  %2696 = vmatprep.subr.bf16.mxu0 %v4785_v61  ;;  %2922 = vmatprep.subr.bf16.mxu1 %v4788_v2 }
 0x1f6   : > { %v4144_v23 = vadd.f32 %v1422_v19, %v5360_v43  ;;  %v4176_v24 = vadd.f32 %v1648_v20, %v5364_v44  ;;  %v1424_v26 = vpop.f32.mrb[18].mxu0  ;;  %v1650_v28 = vpop.f32.mrb[18].mxu1  ;;  %2633 = vmatprep.mubr.bf16.mxu0 %v1762_v11  ;;  %2859 = vmatprep.mubr.bf16.mxu1 %v1762_v11 }
 0x1f7   : > { %v4145_v29 = vadd.f32 %v1424_v26, %v5352_v41  ;;  %v4177_v30 = vadd.f32 %v1650_v28, %v5356_v42  ;;  %v1426_v31 = vpop.f32.mrb[19].mxu0  ;;  %v1652_v32 = vpop.f32.mrb[19].mxu1  ;;  %2634 = vmatmul.mubr.bf16.gmra.mrb[44].mxu0 %v1761_v9  ;;  %2860 = vmatmul.mubr.bf16.gmra.mrb[44].mxu1 %v1761_v9  ;;  %v1717_v47 = vmax.f32 %v4143_v17, 0.0  ;;  %v1719_v48 = vmax.f32 %v4175_v18, 0.0  ;;  %v4806_v9 = vld [vmem:[#allocation6 + $0x32c] ss:$16 sps:$4 sm:$0xff]  }
 0x1f8   : > { %v4146_v33 = vadd.f32 %v1426_v31, %v5360_v43  ;;  %v4178_v34 = vadd.f32 %v1652_v32, %v5364_v44  ;;  %2697 = vmatpush1.bf16.msra.mxu0 %v4783_v15  ;;  %2923 = vmatpush1.bf16.msra.mxu1 %v4786_v16  ;;  %v1718_v54 = vmax.f32 %v4144_v23, 0.0  ;;  %v1720_v55 = vmax.f32 %v4176_v24, 0.0  ;;  %v4804_v23 = vld [vmem:[#allocation6 + $0x328] ss:$16 sps:$4 sm:$0xff]   ;;  %v4809_v24 = vld [vmem:[#allocation6 + $0x344] ss:$16 sps:$4 sm:$0xff]  }
 0x1f9   : > { %v1721_v49 = vmax.f32 %v4145_v29, 0.0  ;;  %v1723_v50 = vmax.f32 %v4177_v30, 0.0  ;;  %2698 = vmatprep.subr.bf16.mxu0 %v4791_v21  ;;  %2924 = vmatprep.subr.bf16.mxu1 %v4794_v22  ;;  %v4801_v22 = vld [vmem:[#allocation6 + $0x320] ss:$16 sps:$4 sm:$0xff]   ;;  %v4812_v31 = vld [vmem:[#allocation6 + $0x34c] ss:$16 sps:$4 sm:$0xff]  }
 0x1fa   : > { %v1722_v56 = vmax.f32 %v4146_v33, 0.0  ;;  %v1724_v57 = vmax.f32 %v4178_v34, 0.0 }
 0x1fb   : > { %v1765_v58 = vpack.c.bf16 %v1721_v49, %v1717_v47  ;;  %v5422_v59 = vpack.c.bf16 %v1723_v50, %v1719_v48 }
 0x1fc   : > { %v1766_v60 = vpack.c.bf16 %v1722_v56, %v1718_v54  ;;  %v5424_v61 = vpack.c.bf16 %v1724_v57, %v1720_v55  ;;  %v1430_v62 = vpop.f32.mrb[20].mxu0  ;;  %v1656_v63 = vpop.f32.mrb[20].mxu1  ;;  %2699 = vmatpush1.bf16.msra.mxu0 %v4789_v38  ;;  %2925 = vmatpush1.bf16.msra.mxu1 %v4792_v45  ;;  %v4810_v54 = vld [vmem:[#allocation6 + $0x348] ss:$16 sps:$4 sm:$0xff]  }
 0x1fd   : > { %v4147_v2 = vadd.f32 %v1430_v62, %v5352_v41  ;;  %v4179_v3 = vadd.f32 %v1656_v63, %v5356_v42  ;;  %v1432_v4 = vpop.f32.mrb[21].mxu0  ;;  %v1658_v5 = vpop.f32.mrb[21].mxu1  ;;  %2700 = vmatprep.subr.bf16.mxu0 %v4797_v46  ;;  %2926 = vmatprep.subr.bf16.mxu1 %v4800_v52  ;;  %v4807_v52 = vld [vmem:[#allocation6 + $0x340] ss:$16 sps:$4 sm:$0xff]   ;;  %v4818_v62 = vld [vmem:[#allocation6 + $0x36c] ss:$16 sps:$4 sm:$0xff]  }
 0x1fe   : > { %v4148_v11 = vadd.f32 %v1432_v4, %v5360_v43  ;;  %v4180_v13 = vadd.f32 %v1658_v5, %v5364_v44  ;;  %v1434_v14 = vpop.f32.mrb[22].mxu0  ;;  %v1660_v15 = vpop.f32.mrb[22].mxu1  ;;  %2643 = vmatprep.mubr.bf16.mxu0 %v1766_v60  ;;  %2869 = vmatprep.mubr.bf16.mxu1 %v1766_v60  ;;  %v4815_v60 = vld [vmem:[#allocation6 + $0x364] ss:$16 sps:$4 sm:$0xff]  }
 0x1ff   : > { %v4149_v16 = vadd.f32 %v1434_v14, %v5352_v41  ;;  %v4181_v17 = vadd.f32 %v1660_v15, %v5356_v42  ;;  %v1436_v18 = vpop.f32.mrb[23].mxu0  ;;  %v1662_v19 = vpop.f32.mrb[23].mxu1  ;;  %2644 = vmatmul.mubr.bf16.gmra.mrb[48].mxu0 %v1765_v58  ;;  %2870 = vmatmul.mubr.bf16.gmra.mrb[48].mxu1 %v1765_v58  ;;  %v1725_v26 = vmax.f32 %v4147_v2, 0.0  ;;  %v1727_v28 = vmax.f32 %v4179_v3, 0.0  ;;  %v4816_v14 = vld [vmem:[#allocation6 + $0x368] ss:$16 sps:$4 sm:$0xff]  }
 0x200   : > { %v4150_v20 = vadd.f32 %v1436_v18, %v5360_v43  ;;  %v4182_v21 = vadd.f32 %v1662_v19, %v5364_v44  ;;  %2701 = vmatpush1.bf16.msra.mxu0 %v4795_v0  ;;  %2927 = vmatpush1.bf16.msra.mxu1 %v4798_v1  ;;  %v1726_v32 = vmax.f32 %v4148_v11, 0.0  ;;  %v1728_v33 = vmax.f32 %v4180_v13, 0.0  ;;  %v4813_v13 = vld [vmem:[#allocation6 + $0x360] ss:$16 sps:$4 sm:$0xff]   ;;  %v4821_v15 = vld [vmem:[#allocation6 + $0x384] ss:$16 sps:$4 sm:$0xff]  }
 0x201   : > { %v1729_v29 = vmax.f32 %v4149_v16, 0.0  ;;  %v1731_v30 = vmax.f32 %v4181_v17, 0.0  ;;  %2702 = vmatprep.subr.bf16.mxu0 %v4803_v7  ;;  %2928 = vmatprep.subr.bf16.mxu1 %v4806_v9 }
 0x202   : > { %v1730_v34 = vmax.f32 %v4150_v20, 0.0  ;;  %v1732_v38 = vmax.f32 %v4182_v21, 0.0  ;;  %v4824_v20 = vld [vmem:[#allocation6 + $0x38c] ss:$16 sps:$4 sm:$0xff]  }
 0x203   : > { %v1769_v45 = vpack.c.bf16 %v1729_v29, %v1725_v26  ;;  %v5434_v46 = vpack.c.bf16 %v1731_v30, %v1727_v28 }
 0x204   : > { %v1770_v47 = vpack.c.bf16 %v1730_v34, %v1726_v32  ;;  %v5436_v48 = vpack.c.bf16 %v1732_v38, %v1728_v33  ;;  %v1440_v49 = vpop.f32.mrb[24].mxu0  ;;  %v1666_v50 = vpop.f32.mrb[24].mxu1  ;;  %2703 = vmatpush1.bf16.msra.mxu0 %v4801_v22  ;;  %2929 = vmatpush1.bf16.msra.mxu1 %v4804_v23  ;;  %v4819_v33 = vld [vmem:[#allocation6 + $0x380] ss:$16 sps:$4 sm:$0xff]   ;;  %v4822_v34 = vld [vmem:[#allocation6 + $0x388] ss:$16 sps:$4 sm:$0xff]  }
 0x205   : > { %v4151_v55 = vadd.f32 %v1440_v49, %v5352_v41  ;;  %v4183_v56 = vadd.f32 %v1666_v50, %v5356_v42  ;;  %v1442_v57 = vpop.f32.mrb[25].mxu0  ;;  %v1668_v58 = vpop.f32.mrb[25].mxu1  ;;  %2704 = vmatprep.subr.bf16.mxu0 %v4809_v24  ;;  %2930 = vmatprep.subr.bf16.mxu1 %v4812_v31  ;;  %v4827_v50 = vld [vmem:[#allocation6 + $0x3a4] ss:$16 sps:$4 sm:$0xff]  }
 0x206   : > { %v4152_v63 = vadd.f32 %v1442_v57, %v5360_v43  ;;  %v4184_v0 = vadd.f32 %v1668_v58, %v5364_v44  ;;  %v1444_v1 = vpop.f32.mrb[26].mxu0  ;;  %v1670_v2 = vpop.f32.mrb[26].mxu1  ;;  %2653 = vmatprep.mubr.bf16.mxu0 %v1770_v47  ;;  %2879 = vmatprep.mubr.bf16.mxu1 %v1770_v47 }
 0x207   : > { %v4153_v3 = vadd.f32 %v1444_v1, %v5352_v41  ;;  %v4185_v4 = vadd.f32 %v1670_v2, %v5356_v42  ;;  %v1446_v5 = vpop.f32.mrb[27].mxu0  ;;  %v1672_v7 = vpop.f32.mrb[27].mxu1  ;;  %2654 = vmatmul.mubr.bf16.gmra.mrb[52].mxu0 %v1769_v45  ;;  %2880 = vmatmul.mubr.bf16.gmra.mrb[52].mxu1 %v1769_v45  ;;  %v1733_v16 = vmax.f32 %v4151_v55, 0.0  ;;  %v1735_v17 = vmax.f32 %v4183_v56, 0.0  ;;  %v4825_v2 = vld [vmem:[#allocation6 + $0x3a0] ss:$16 sps:$4 sm:$0xff]  }
 0x208   : > { %v4154_v9 = vadd.f32 %v1446_v5, %v5360_v43  ;;  %v4186_v11 = vadd.f32 %v1672_v7, %v5364_v44  ;;  %2705 = vmatpush1.bf16.msra.mxu0 %v4807_v52  ;;  %2931 = vmatpush1.bf16.msra.mxu1 %v4810_v54  ;;  %v1734_v21 = vmax.f32 %v4152_v63, 0.0  ;;  %v1736_v22 = vmax.f32 %v4184_v0, 0.0  ;;  %v4830_v52 = vld [vmem:[#allocation6 + $0x3ac] ss:$16 sps:$4 sm:$0xff]  }
 0x209   : > { %v1737_v18 = vmax.f32 %v4153_v3, 0.0  ;;  %v1739_v19 = vmax.f32 %v4185_v4, 0.0  ;;  %2706 = vmatprep.subr.bf16.mxu0 %v4815_v60  ;;  %2932 = vmatprep.subr.bf16.mxu1 %v4818_v62  ;;  %v4828_v3 = vld [vmem:[#allocation6 + $0x3a8] ss:$16 sps:$4 sm:$0xff]   ;;  %v4833_v4 = vld [vmem:[#allocation6 + $0x3c4] ss:$16 sps:$4 sm:$0xff]  }
 0x20a   : > { %v1738_v23 = vmax.f32 %v4154_v9, 0.0  ;;  %v1740_v24 = vmax.f32 %v4186_v11, 0.0 }
 0x20b   : > { %v1773_v26 = vpack.c.bf16 %v1737_v18, %v1733_v16  ;;  %v5446_v28 = vpack.c.bf16 %v1739_v19, %v1735_v17  ;;  %v4831_v18 = vld [vmem:[#allocation6 + $0x3c0] ss:$16 sps:$4 sm:$0xff]   ;;  %v4834_v19 = vld [vmem:[#allocation6 + $0x3c8] ss:$16 sps:$4 sm:$0xff]  }
 0x20c   : > { %v1774_v29 = vpack.c.bf16 %v1738_v23, %v1734_v21  ;;  %v5448_v30 = vpack.c.bf16 %v1740_v24, %v1736_v22  ;;  %v1450_v31 = vpop.f32.mrb[28].mxu0  ;;  %v1676_v32 = vpop.f32.mrb[28].mxu1  ;;  %2707 = vmatpush1.bf16.msra.mxu0 %v4813_v13  ;;  %2933 = vmatpush1.bf16.msra.mxu1 %v4816_v14  ;;  %v4842_v21 = vld [vmem:[#allocation6 + $0x3ec] ss:$16 sps:$4 sm:$0xff]   ;;  %v4837_v22 = vld [vmem:[#allocation6 + $0x3e0] ss:$16 sps:$4 sm:$0xff]  }
 0x20d   : > { %v4155_v38 = vadd.f32 %v1450_v31, %v5352_v41  ;;  %v4187_v45 = vadd.f32 %v1676_v32, %v5356_v42  ;;  %v1452_v47 = vpop.f32.mrb[29].mxu0  ;;  %v1678_v49 = vpop.f32.mrb[29].mxu1  ;;  %2708 = vmatprep.subr.bf16.mxu0 %v4821_v15  ;;  %2934 = vmatprep.subr.bf16.mxu1 %v4824_v20  ;;  %v4839_v20 = vld [vmem:[#allocation6 + $0x3e4] ss:$16 sps:$4 sm:$0xff]   ;;  %v4840_v23 = vld [vmem:[#allocation6 + $0x3e8] ss:$16 sps:$4 sm:$0xff]  }
 0x20e   : > { %v4156_v54 = vadd.f32 %v1452_v47, %v5360_v43  ;;  %v4188_v55 = vadd.f32 %v1678_v49, %v5364_v44  ;;  %v1454_v56 = vpop.f32.mrb[30].mxu0  ;;  %v1680_v57 = vpop.f32.mrb[30].mxu1  ;;  %2663 = vmatprep.mubr.bf16.mxu0 %v1774_v29  ;;  %2889 = vmatprep.mubr.bf16.mxu1 %v1774_v29  ;;  %v4843_v24 = vld [vmem:[#allocation7 + $0x40] sm:$0xff]   ;;  %v4847_v32 = vld [vmem:[#allocation7 + $0x48] sm:$0xff]   ;;  %v4852_v47 = vld [vmem:[#allocation7 + $0x10] sm:$0xff]  }
 0x20f   : > { %v4157_v58 = vadd.f32 %v1454_v56, %v5352_v41  ;;  %v4189_v60 = vadd.f32 %v1680_v57, %v5356_v42  ;;  %v1456_v62 = vpop.f32.mrb[31].mxu0  ;;  %v1682_v63 = vpop.f32.mrb[31].mxu1  ;;  %2664 = vmatmul.mubr.bf16.gmra.mrb[56].mxu0 %v1773_v26  ;;  %2890 = vmatmul.mubr.bf16.gmra.mrb[56].mxu1 %v1773_v26  ;;  %v1741_v5 = vmax.f32 %v4155_v38, 0.0  ;;  %v1743_v7 = vmax.f32 %v4187_v45, 0.0  ;;  %v4836_v41 = vld [vmem:[#allocation6 + $0x3cc] ss:$16 sps:$4 sm:$0xff]  }
 0x210   : > { %v4158_v0 = vadd.f32 %v1456_v62, %v5360_v43  ;;  %v4190_v1 = vadd.f32 %v1682_v63, %v5364_v44  ;;  %2709 = vmatpush1.bf16.msra.mxu0 %v4819_v33  ;;  %2935 = vmatpush1.bf16.msra.mxu1 %v4822_v34  ;;  %v1742_v42 = vmax.f32 %v4156_v54, 0.0  ;;  %v1744_v13 = vmax.f32 %v4188_v55, 0.0  ;;  %v4845_v26 = vld [vmem:[#allocation7 + $0xc0] sm:$0xff]   ;;  %v4849_v33 = vld [vmem:[#allocation7 + $0xc8] sm:$0xff]   ;;  %v4851_v38 = vld [vmem:[#allocation7 + $0x50] sm:$0xff]  }
 0x211   : > { %v1745_v9 = vmax.f32 %v4157_v58, 0.0  ;;  %v1747_v11 = vmax.f32 %v4189_v60, 0.0  ;;  %2710 = vmatprep.subr.bf16.mxu0 %v4827_v50  ;;  %2936 = vmatprep.subr.bf16.mxu1 %v4830_v52  ;;  %v4844_v29 = vld [vmem:[#allocation7] sm:$0xff]   ;;  %v4850_v34 = vld [vmem:[#allocation7 + $0x88] sm:$0xff]   ;;  %v4853_v45 = vld [vmem:[#allocation7 + $0xd0] sm:$0xff]  }
 0x212   : > { %v1746_v14 = vmax.f32 %v4158_v0, 0.0  ;;  %v1748_v15 = vmax.f32 %v4190_v1, 0.0  ;;  %v4846_v31 = vld [vmem:[#allocation7 + $0x80] sm:$0xff]   ;;  %v4854_v49 = vld [vmem:[#allocation7 + $0x90] sm:$0xff]   ;;  %v4855_v50 = vld [vmem:[#allocation7 + $0x58] sm:$0xff]  }
 0x213   : > { %v1777_v16 = vpack.c.bf16 %v1745_v9, %v1741_v5  ;;  %v5458_v43 = vpack.c.bf16 %v1747_v11, %v1743_v7  ;;  %v4858_v52 = vld [vmem:[#allocation7 + $0x98] sm:$0xff]   ;;  %v4859_v54 = vld [vmem:[#allocation7 + $0x60] sm:$0xff]   ;;  %v4863_v58 = vld [vmem:[#allocation7 + $0x68] sm:$0xff]  }
 0x214   : > { %v1778_v44 = vpack.c.bf16 %v1746_v14, %v1742_v42  ;;  %v5460_v17 = vpack.c.bf16 %v1748_v15, %v1744_v13  ;;  %2711 = vmatpush1.bf16.msra.mxu0 %v4825_v2  ;;  %2937 = vmatpush1.bf16.msra.mxu1 %v4828_v3  ;;  %v4861_v55 = vld [vmem:[#allocation7 + $0xe0] sm:$0xff]   ;;  %v4866_v60 = vld [vmem:[#allocation7 + $0xa8] sm:$0xff]   ;;  %v4867_v62 = vld [vmem:[#allocation7 + $0x70] sm:$0xff]  }
 0x215   : > { %2712 = vmatprep.subr.bf16.mxu0 %v4833_v4  ;;  %2938 = vmatprep.subr.bf16.mxu1 %v4836_v41  ;;  %v4860_v56 = vld [vmem:[#allocation7 + $0x20] sm:$0xff]   ;;  %v4869_v63 = vld [vmem:[#allocation7 + $0xf0] sm:$0xff]  }
 0x216   : > { %2673 = vmatprep.mubr.bf16.mxu0 %v1778_v44  ;;  %2899 = vmatprep.mubr.bf16.mxu1 %v1778_v44  ;;  %v4862_v57 = vld [vmem:[#allocation7 + $0xa0] sm:$0xff]   ;;  %v4868_v0 = vld [vmem:[#allocation7 + $0x30] sm:$0xff]  }
 0x217   : > { %2674 = vmatmul.mubr.bf16.gmra.mrb[60].mxu0 %v1777_v16  ;;  %2900 = vmatmul.mubr.bf16.gmra.mrb[60].mxu1 %v1777_v16  ;;  %v4870_v1 = vld [vmem:[#allocation7 + $0xb0] sm:$0xff]  }
 0x218   : > { %2713 = vmatpush1.bf16.msra.mxu0 %v4831_v18  ;;  %2716 = vmatprep.mubr.bf16.mxu0 %v5376_v8 }
 0x219   : > { %2939 = vmatpush1.bf16.msra.mxu1 %v4834_v19  ;;  %2942 = vmatprep.mubr.bf16.mxu1 %v5376_v8  ;;  %v4848_v8 = vld [vmem:[#allocation7 + $0x8] sm:$0xff]  }
 0x21a   : > { %2714 = vmatprep.subr.bf16.mxu0 %v4839_v20  ;;  %2940 = vmatprep.subr.bf16.mxu1 %v4842_v21 }
 0x21c   : > { %2715 = vmatpush1.bf16.msra.mxu0 %v4837_v22 }
 0x21d   : > { %2941 = vmatpush1.bf16.msra.mxu1 %v4840_v23  ;;  %3999 = vmatprep.subr.bf16.mxu0 %v4843_v24 }
 0x21e   : > { %4063 = vmatprep.subr.bf16.mxu1 %v4845_v26 }
 0x21f   : > { %2717 = vmatmul.mubr.bf16.vlgmr.msra.gmra.mrb[32].mxu0 %v5374_v6 }
 0x220   : > { %2943 = vmatmul.mubr.bf16.vlgmr.msra.gmra.mrb[32].mxu1 %v5374_v6  ;;  %2726 = vmatprep.mubr.bf16.mxu0 %v5388_v53  ;;  %v4857_v6 = vld [vmem:[#allocation7 + $0xd8] sm:$0xff]  }
 0x221   : > { %2952 = vmatprep.mubr.bf16.mxu1 %v5388_v53  ;;  %4000 = vmatpush3.bf16.msra.mxu0 %v4844_v29  ;;  %v4856_v53 = vld [vmem:[#allocation7 + $0x18] sm:$0xff]  }
 0x222   : > { %4064 = vmatpush3.bf16.msra.mxu1 %v4846_v31  ;;  %4001 = vmatprep.subr.bf16.mxu0 %v4847_v32 }
 0x223   : > { %4065 = vmatprep.subr.bf16.mxu1 %v4849_v33 }
 0x225   : > { %4002 = vmatpush3.bf16.msra.mxu0 %v4848_v8 }
 0x226   : > { %4066 = vmatpush3.bf16.msra.mxu1 %v4850_v34  ;;  %4003 = vmatprep.subr.bf16.mxu0 %v4851_v38 }
 0x227   : > { %2727 = vmatmul.mubr.bf16.gmra.mrb[36].mxu0 %v5386_v51  ;;  %4067 = vmatprep.subr.bf16.mxu1 %v4853_v45 }
 0x228   : > { %2953 = vmatmul.mubr.bf16.gmra.mrb[36].mxu1 %v5386_v51  ;;  %2736 = vmatprep.mubr.bf16.mxu0 %v5400_v27  ;;  %v4865_v51 = vld [vmem:[#allocation7 + $0xe8] sm:$0xff]  }
 0x229   : > { %2962 = vmatprep.mubr.bf16.mxu1 %v5400_v27  ;;  %4004 = vmatpush3.bf16.msra.mxu0 %v4852_v47  ;;  %v4864_v27 = vld [vmem:[#allocation7 + $0x28] sm:$0xff]  }
 0x22a   : > { %4068 = vmatpush3.bf16.msra.mxu1 %v4854_v49  ;;  %4005 = vmatprep.subr.bf16.mxu0 %v4855_v50 }
 0x22b   : > { %4069 = vmatprep.subr.bf16.mxu1 %v4857_v6 }
 0x22d   : > { %4006 = vmatpush3.bf16.msra.mxu0 %v4856_v53 }
 0x22e   : > { %4070 = vmatpush3.bf16.msra.mxu1 %v4858_v52  ;;  %4007 = vmatprep.subr.bf16.mxu0 %v4859_v54 }
 0x22f   : > { %2737 = vmatmul.mubr.bf16.gmra.mrb[40].mxu0 %v5398_v25  ;;  %4071 = vmatprep.subr.bf16.mxu1 %v4861_v55 }
 0x230   : > { %2963 = vmatmul.mubr.bf16.gmra.mrb[40].mxu1 %v5398_v25  ;;  %2746 = vmatprep.mubr.bf16.mxu0 %v5412_v12  ;;  %v4871_v25 = vld [vmem:[#allocation7 + $0x78] sm:$0xff]  }
 0x231   : > { %2972 = vmatprep.mubr.bf16.mxu1 %v5412_v12  ;;  %4008 = vmatpush3.bf16.msra.mxu0 %v4860_v56  ;;  %v4872_v12 = vld [vmem:[#allocation7 + $0x38] sm:$0xff]  }
 0x232   : > { %4072 = vmatpush3.bf16.msra.mxu1 %v4862_v57  ;;  %4009 = vmatprep.subr.bf16.mxu0 %v4863_v58 }
 0x233   : > { %4073 = vmatprep.subr.bf16.mxu1 %v4865_v51 }
 0x235   : > { %4010 = vmatpush3.bf16.msra.mxu0 %v4864_v27 }
 0x236   : > { %4074 = vmatpush3.bf16.msra.mxu1 %v4866_v60  ;;  %4011 = vmatprep.subr.bf16.mxu0 %v4867_v62 }
 0x237   : > { %2747 = vmatmul.mubr.bf16.gmra.mrb[44].mxu0 %v5410_v10  ;;  %4075 = vmatprep.subr.bf16.mxu1 %v4869_v63 }
 0x238   : > { %2973 = vmatmul.mubr.bf16.gmra.mrb[44].mxu1 %v5410_v10  ;;  %2756 = vmatprep.mubr.bf16.mxu0 %v5424_v61  ;;  %v4873_v10 = vld [vmem:[#allocation7 + $0xf8] sm:$0xff]  }
 0x239   : > { %2982 = vmatprep.mubr.bf16.mxu1 %v5424_v61  ;;  %4012 = vmatpush3.bf16.msra.mxu0 %v4868_v0  ;;  %v1909_v61 = vld [vmem:[%s5638_s4] sm:$0xf] }
 0x23a   : > { %4076 = vmatpush3.bf16.msra.mxu1 %v4870_v1  ;;  %4013 = vmatprep.subr.bf16.mxu0 %v4871_v25 }
 0x23b   : > { %4077 = vmatprep.subr.bf16.mxu1 %v4873_v10 }
 0x23d   : > { %4014 = vmatpush3.bf16.msra.mxu0 %v4872_v12 }
 0x23f   : > { %2757 = vmatmul.mubr.bf16.gmra.mrb[48].mxu0 %v5422_v59 }
 0x240   : > { %2983 = vmatmul.mubr.bf16.gmra.mrb[48].mxu1 %v5422_v59  ;;  %2766 = vmatprep.mubr.bf16.mxu0 %v5436_v48  ;;  %v4874_v59 = vld [vmem:[#allocation7 + $0xb8] sm:$0xff]  }
 0x241   : > { %2992 = vmatprep.mubr.bf16.mxu1 %v5436_v48  ;;  %4078 = vmatpush3.bf16.msra.mxu1 %v4874_v59  ;;  %v5503_v48 = vrot.slane %v1909_v61, %v583_v37 }
 0x247   : > { %2767 = vmatmul.mubr.bf16.gmra.mrb[52].mxu0 %v5434_v46 }
 0x248   : > { %2993 = vmatmul.mubr.bf16.gmra.mrb[52].mxu1 %v5434_v46  ;;  %2776 = vmatprep.mubr.bf16.mxu0 %v5448_v30  ;;  %v5499_v46 = vrot.slane %v1909_v61, %v575_v36 }
 0x249   : > { %3002 = vmatprep.mubr.bf16.mxu1 %v5448_v30  ;;  %v5511_v30 = vrot.slane %v1909_v61, %v587_v40 }
 0x24f   : > { %2777 = vmatmul.mubr.bf16.gmra.mrb[56].mxu0 %v5446_v28 }
 0x250   : > { %3003 = vmatmul.mubr.bf16.gmra.mrb[56].mxu1 %v5446_v28  ;;  %2786 = vmatprep.mubr.bf16.mxu0 %v5460_v17  ;;  %v5507_v28 = vrot.slane %v1909_v61, %v579_v39 }
 0x251   : > { %3012 = vmatprep.mubr.bf16.mxu1 %v5460_v17 }
 0x257   : > { %2787 = vmatmul.mubr.bf16.gmra.mrb[60].mxu0 %v5458_v43 }
 0x258   : > { %3013 = vmatmul.mubr.bf16.gmra.mrb[60].mxu1 %v5458_v43 }
 0x2f2   : > { %v2718_v2 = vpop.f32.mrb[32].mxu0 }
 0x2f3   : > { %v4191_v3 = vadd.f32 %v2718_v2, %v5499_v46  ;;  %v2944_v4 = vpop.f32.mrb[32].mxu1  ;;  %v2720_v5 = vpop.f32.mrb[33].mxu0 }
 0x2f4   : > { %v4223_v36 = vadd.f32 %v2944_v4, %v5503_v48  ;;  %v4192_v7 = vadd.f32 %v2720_v5, %v5507_v28  ;;  %v2946_v9 = vpop.f32.mrb[33].mxu1  ;;  %v2722_v37 = vpop.f32.mrb[34].mxu0 }
 0x2f5   : > { %v4224_v11 = vadd.f32 %v2946_v9, %v5511_v30  ;;  %v4193_v39 = vadd.f32 %v2722_v37, %v5499_v46  ;;  %v2948_v41 = vpop.f32.mrb[34].mxu1  ;;  %v2724_v42 = vpop.f32.mrb[35].mxu0  ;;  %v3023_v14 = vmax.f32 %v4191_v3, 0.0 }
 0x2f6   : > { %v4225_v35 = vadd.f32 %v2948_v41, %v5503_v48  ;;  %v4194_v40 = vadd.f32 %v2724_v42, %v5507_v28  ;;  %v2950_v13 = vpop.f32.mrb[35].mxu1  ;;  %v3025_v43 = vmax.f32 %v4223_v36, 0.0  ;;  %v3024_v44 = vmax.f32 %v4192_v7, 0.0 }
 0x2f7   : > { %v3027_v15 = vmax.f32 %v4193_v39, 0.0  ;;  %v4226_v16 = vadd.f32 %v2950_v13, %v5511_v30  ;;  %v3026_v19 = vmax.f32 %v4224_v11, 0.0 }
 0x2f8   : > { %v3029_v17 = vmax.f32 %v4225_v35, 0.0  ;;  %v3028_v18 = vmax.f32 %v4194_v40, 0.0 }
 0x2f9   : > { %v3087_v20 = vpack.c.bf16 %v3027_v15, %v3023_v14  ;;  %v3030_v21 = vmax.f32 %v4226_v16, 0.0 }
 0x2fa   : > { %v3089_v22 = vpack.c.bf16 %v3029_v17, %v3025_v43  ;;  %v3088_v23 = vpack.c.bf16 %v3028_v18, %v3024_v44  ;;  %v2728_v24 = vpop.f32.mrb[36].mxu0 }
 0x2fb   : > { %v3090_v26 = vpack.c.bf16 %v3030_v21, %v3026_v19  ;;  %v4195_v29 = vadd.f32 %v2728_v24, %v5499_v46  ;;  %v2954_v31 = vpop.f32.mrb[36].mxu1  ;;  %v2730_v32 = vpop.f32.mrb[37].mxu0 }
 0x2fc   : > { %v4227_v33 = vadd.f32 %v2954_v31, %v5503_v48  ;;  %v4196_v8 = vadd.f32 %v2730_v32, %v5507_v28  ;;  %v2956_v34 = vpop.f32.mrb[37].mxu1  ;;  %v2732_v38 = vpop.f32.mrb[38].mxu0  ;;  %3414 = vmatprep.mubr.bf16.mxu0 %v3088_v23 }
 0x2fd   : > { %v4228_v45 = vadd.f32 %v2956_v34, %v5511_v30  ;;  %v4197_v47 = vadd.f32 %v2732_v38, %v5499_v46  ;;  %v2958_v49 = vpop.f32.mrb[38].mxu1  ;;  %3511 = vmatprep.mubr.bf16.mxu1 %v3090_v26  ;;  %v2734_v50 = vpop.f32.mrb[39].mxu0  ;;  %3415 = vmatmul.mubr.bf16.vlgmr.msra.gmra.mrb[64].mxu0 %v3087_v20  ;;  %v3031_v54 = vmax.f32 %v4195_v29, 0.0 }
 0x2fe   : > { %v4229_v6 = vadd.f32 %v2958_v49, %v5503_v48  ;;  %v4198_v53 = vadd.f32 %v2734_v50, %v5507_v28  ;;  %v2960_v52 = vpop.f32.mrb[39].mxu1  ;;  %3512 = vmatmul.mubr.bf16.vlgmr.msra.gmra.mrb[64].mxu1 %v3089_v22  ;;  %v3033_v57 = vmax.f32 %v4227_v33, 0.0  ;;  %v3032_v58 = vmax.f32 %v4196_v8, 0.0 }
 0x2ff   : > { %v3035_v55 = vmax.f32 %v4197_v47, 0.0  ;;  %v4230_v56 = vadd.f32 %v2960_v52, %v5511_v30  ;;  %v3034_v60 = vmax.f32 %v4228_v45, 0.0 }
 0x300   : > { %v3037_v51 = vmax.f32 %v4229_v6, 0.0  ;;  %v3036_v27 = vmax.f32 %v4198_v53, 0.0 }
 0x301   : > { %v3091_v62 = vpack.c.bf16 %v3035_v55, %v3031_v54  ;;  %v3038_v63 = vmax.f32 %v4230_v56, 0.0 }
 0x302   : > { %v3093_v0 = vpack.c.bf16 %v3037_v51, %v3033_v57  ;;  %v3092_v1 = vpack.c.bf16 %v3036_v27, %v3032_v58  ;;  %v2738_v25 = vpop.f32.mrb[40].mxu0 }
 0x303   : > { %v3094_v10 = vpack.c.bf16 %v3038_v63, %v3034_v60  ;;  %v4199_v12 = vadd.f32 %v2738_v25, %v5499_v46  ;;  %v2964_v59 = vpop.f32.mrb[40].mxu1  ;;  %v2740_v61 = vpop.f32.mrb[41].mxu0 }
 0x304   : > { %v4231_v2 = vadd.f32 %v2964_v59, %v5503_v48  ;;  %v4200_v3 = vadd.f32 %v2740_v61, %v5507_v28  ;;  %v2966_v4 = vpop.f32.mrb[41].mxu1  ;;  %v2742_v5 = vpop.f32.mrb[42].mxu0  ;;  %3422 = vmatprep.mubr.bf16.mxu0 %v3092_v1 }
 0x305   : > { %v4232_v36 = vadd.f32 %v2966_v4, %v5511_v30  ;;  %v4201_v7 = vadd.f32 %v2742_v5, %v5499_v46  ;;  %v2968_v9 = vpop.f32.mrb[42].mxu1  ;;  %3519 = vmatprep.mubr.bf16.mxu1 %v3094_v10  ;;  %v2744_v37 = vpop.f32.mrb[43].mxu0  ;;  %3423 = vmatmul.mubr.bf16.gmra.mrb[68].mxu0 %v3091_v62  ;;  %v3039_v42 = vmax.f32 %v4199_v12, 0.0 }
 0x306   : > { %v4233_v11 = vadd.f32 %v2968_v9, %v5503_v48  ;;  %v4202_v39 = vadd.f32 %v2744_v37, %v5507_v28  ;;  %v2970_v41 = vpop.f32.mrb[43].mxu1  ;;  %3520 = vmatmul.mubr.bf16.gmra.mrb[68].mxu1 %v3093_v0  ;;  %v3041_v13 = vmax.f32 %v4231_v2, 0.0  ;;  %v3040_v14 = vmax.f32 %v4200_v3, 0.0 }
 0x307   : > { %v3043_v35 = vmax.f32 %v4201_v7, 0.0  ;;  %v4234_v40 = vadd.f32 %v2970_v41, %v5511_v30  ;;  %v3042_v43 = vmax.f32 %v4232_v36, 0.0 }
 0x308   : > { %v3045_v15 = vmax.f32 %v4233_v11, 0.0  ;;  %v3044_v16 = vmax.f32 %v4202_v39, 0.0 }
 0x309   : > { %v3095_v44 = vpack.c.bf16 %v3043_v35, %v3039_v42  ;;  %v3046_v17 = vmax.f32 %v4234_v40, 0.0 }
 0x30a   : > { %v3097_v18 = vpack.c.bf16 %v3045_v15, %v3041_v13  ;;  %v3096_v19 = vpack.c.bf16 %v3044_v16, %v3040_v14  ;;  %v2748_v20 = vpop.f32.mrb[44].mxu0 }
 0x30b   : > { %v3098_v21 = vpack.c.bf16 %v3046_v17, %v3042_v43  ;;  %v4203_v22 = vadd.f32 %v2748_v20, %v5499_v46  ;;  %v2974_v23 = vpop.f32.mrb[44].mxu1  ;;  %v2750_v24 = vpop.f32.mrb[45].mxu0 }
 0x30c   : > { %v4235_v26 = vadd.f32 %v2974_v23, %v5503_v48  ;;  %v4204_v29 = vadd.f32 %v2750_v24, %v5507_v28  ;;  %v2976_v31 = vpop.f32.mrb[45].mxu1  ;;  %v2752_v32 = vpop.f32.mrb[46].mxu0  ;;  %3430 = vmatprep.mubr.bf16.mxu0 %v3096_v19 }
 0x30d   : > { %v4236_v33 = vadd.f32 %v2976_v31, %v5511_v30  ;;  %v4205_v8 = vadd.f32 %v2752_v32, %v5499_v46  ;;  %v2978_v34 = vpop.f32.mrb[46].mxu1  ;;  %3527 = vmatprep.mubr.bf16.mxu1 %v3098_v21  ;;  %v2754_v38 = vpop.f32.mrb[47].mxu0  ;;  %3431 = vmatmul.mubr.bf16.gmra.mrb[72].mxu0 %v3095_v44  ;;  %v3047_v50 = vmax.f32 %v4203_v22, 0.0 }
 0x30e   : > { %v4237_v45 = vadd.f32 %v2978_v34, %v5503_v48  ;;  %v4206_v47 = vadd.f32 %v2754_v38, %v5507_v28  ;;  %v2980_v49 = vpop.f32.mrb[47].mxu1  ;;  %3528 = vmatmul.mubr.bf16.gmra.mrb[72].mxu1 %v3097_v18  ;;  %v3049_v52 = vmax.f32 %v4235_v26, 0.0  ;;  %v3048_v54 = vmax.f32 %v4204_v29, 0.0 }
 0x30f   : > { %v3051_v6 = vmax.f32 %v4205_v8, 0.0  ;;  %v4238_v53 = vadd.f32 %v2980_v49, %v5511_v30  ;;  %v3050_v57 = vmax.f32 %v4236_v33, 0.0 }
 0x310   : > { %v3053_v55 = vmax.f32 %v4237_v45, 0.0  ;;  %v3052_v56 = vmax.f32 %v4206_v47, 0.0 }
 0x311   : > { %v3099_v58 = vpack.c.bf16 %v3051_v6, %v3047_v50  ;;  %v3054_v51 = vmax.f32 %v4238_v53, 0.0 }
 0x312   : > { %v3101_v27 = vpack.c.bf16 %v3053_v55, %v3049_v52  ;;  %v3100_v60 = vpack.c.bf16 %v3052_v56, %v3048_v54  ;;  %v2758_v62 = vpop.f32.mrb[48].mxu0 }
 0x313   : > { %v3102_v63 = vpack.c.bf16 %v3054_v51, %v3050_v57  ;;  %v4207_v0 = vadd.f32 %v2758_v62, %v5499_v46  ;;  %v2984_v1 = vpop.f32.mrb[48].mxu1  ;;  %v2760_v25 = vpop.f32.mrb[49].mxu0 }
 0x314   : > { %v4239_v10 = vadd.f32 %v2984_v1, %v5503_v48  ;;  %v4208_v12 = vadd.f32 %v2760_v25, %v5507_v28  ;;  %v2986_v59 = vpop.f32.mrb[49].mxu1  ;;  %v2762_v61 = vpop.f32.mrb[50].mxu0  ;;  %3438 = vmatprep.mubr.bf16.mxu0 %v3100_v60 }
 0x315   : > { %v4240_v2 = vadd.f32 %v2986_v59, %v5511_v30  ;;  %v4209_v3 = vadd.f32 %v2762_v61, %v5499_v46  ;;  %v2988_v4 = vpop.f32.mrb[50].mxu1  ;;  %3535 = vmatprep.mubr.bf16.mxu1 %v3102_v63  ;;  %v2764_v5 = vpop.f32.mrb[51].mxu0  ;;  %3439 = vmatmul.mubr.bf16.gmra.mrb[76].mxu0 %v3099_v58  ;;  %v3055_v37 = vmax.f32 %v4207_v0, 0.0 }
 0x316   : > { %v4241_v36 = vadd.f32 %v2988_v4, %v5503_v48  ;;  %v4210_v7 = vadd.f32 %v2764_v5, %v5507_v28  ;;  %v2990_v9 = vpop.f32.mrb[51].mxu1  ;;  %3536 = vmatmul.mubr.bf16.gmra.mrb[76].mxu1 %v3101_v27  ;;  %v3057_v41 = vmax.f32 %v4239_v10, 0.0  ;;  %v3056_v42 = vmax.f32 %v4208_v12, 0.0 }
 0x317   : > { %v3059_v11 = vmax.f32 %v4209_v3, 0.0  ;;  %v4242_v39 = vadd.f32 %v2990_v9, %v5511_v30  ;;  %v3058_v13 = vmax.f32 %v4240_v2, 0.0 }
 0x318   : > { %v3061_v35 = vmax.f32 %v4241_v36, 0.0  ;;  %v3060_v40 = vmax.f32 %v4210_v7, 0.0 }
 0x319   : > { %v3103_v14 = vpack.c.bf16 %v3059_v11, %v3055_v37  ;;  %v3062_v15 = vmax.f32 %v4242_v39, 0.0 }
 0x31a   : > { %v3105_v16 = vpack.c.bf16 %v3061_v35, %v3057_v41  ;;  %v3104_v43 = vpack.c.bf16 %v3060_v40, %v3056_v42  ;;  %v2768_v44 = vpop.f32.mrb[52].mxu0 }
 0x31b   : > { %v3106_v17 = vpack.c.bf16 %v3062_v15, %v3058_v13  ;;  %v4211_v18 = vadd.f32 %v2768_v44, %v5499_v46  ;;  %v2994_v19 = vpop.f32.mrb[52].mxu1  ;;  %v2770_v20 = vpop.f32.mrb[53].mxu0 }
 0x31c   : > { %v4243_v21 = vadd.f32 %v2994_v19, %v5503_v48  ;;  %v4212_v22 = vadd.f32 %v2770_v20, %v5507_v28  ;;  %v2996_v23 = vpop.f32.mrb[53].mxu1  ;;  %v2772_v24 = vpop.f32.mrb[54].mxu0  ;;  %3446 = vmatprep.mubr.bf16.mxu0 %v3104_v43 }
 0x31d   : > { %v4244_v26 = vadd.f32 %v2996_v23, %v5511_v30  ;;  %v4213_v29 = vadd.f32 %v2772_v24, %v5499_v46  ;;  %v2998_v31 = vpop.f32.mrb[54].mxu1  ;;  %3543 = vmatprep.mubr.bf16.mxu1 %v3106_v17  ;;  %v2774_v32 = vpop.f32.mrb[55].mxu0  ;;  %3447 = vmatmul.mubr.bf16.gmra.mrb[80].mxu0 %v3103_v14  ;;  %v3063_v38 = vmax.f32 %v4211_v18, 0.0 }
 0x31e   : > { %v4245_v33 = vadd.f32 %v2998_v31, %v5503_v48  ;;  %v4214_v8 = vadd.f32 %v2774_v32, %v5507_v28  ;;  %v3000_v34 = vpop.f32.mrb[55].mxu1  ;;  %3544 = vmatmul.mubr.bf16.gmra.mrb[80].mxu1 %v3105_v16  ;;  %v3065_v49 = vmax.f32 %v4243_v21, 0.0  ;;  %v3064_v50 = vmax.f32 %v4212_v22, 0.0 }
 0x31f   : > { %v3067_v45 = vmax.f32 %v4213_v29, 0.0  ;;  %v4246_v47 = vadd.f32 %v3000_v34, %v5511_v30  ;;  %v3066_v52 = vmax.f32 %v4244_v26, 0.0 }
 0x320   : > { %v3069_v6 = vmax.f32 %v4245_v33, 0.0  ;;  %v3068_v53 = vmax.f32 %v4214_v8, 0.0 }
 0x321   : > { %v3107_v54 = vpack.c.bf16 %v3067_v45, %v3063_v38  ;;  %v3070_v55 = vmax.f32 %v4246_v47, 0.0 }
 0x322   : > { %v3109_v56 = vpack.c.bf16 %v3069_v6, %v3065_v49  ;;  %v3108_v57 = vpack.c.bf16 %v3068_v53, %v3064_v50  ;;  %v2778_v58 = vpop.f32.mrb[56].mxu0 }
 0x323   : > { %v3110_v51 = vpack.c.bf16 %v3070_v55, %v3066_v52  ;;  %v4215_v27 = vadd.f32 %v2778_v58, %v5499_v46  ;;  %v3004_v60 = vpop.f32.mrb[56].mxu1  ;;  %v2780_v62 = vpop.f32.mrb[57].mxu0 }
 0x324   : > { %v4247_v63 = vadd.f32 %v3004_v60, %v5503_v48  ;;  %v4216_v0 = vadd.f32 %v2780_v62, %v5507_v28  ;;  %v3006_v1 = vpop.f32.mrb[57].mxu1  ;;  %v2782_v25 = vpop.f32.mrb[58].mxu0  ;;  %3454 = vmatprep.mubr.bf16.mxu0 %v3108_v57 }
 0x325   : > { %v4248_v10 = vadd.f32 %v3006_v1, %v5511_v30  ;;  %v4217_v12 = vadd.f32 %v2782_v25, %v5499_v46  ;;  %v3008_v59 = vpop.f32.mrb[58].mxu1  ;;  %3551 = vmatprep.mubr.bf16.mxu1 %v3110_v51  ;;  %v2784_v61 = vpop.f32.mrb[59].mxu0  ;;  %3455 = vmatmul.mubr.bf16.gmra.mrb[84].mxu0 %v3107_v54  ;;  %v3071_v5 = vmax.f32 %v4215_v27, 0.0 }
 0x326   : > { %v4249_v2 = vadd.f32 %v3008_v59, %v5503_v48  ;;  %v4218_v3 = vadd.f32 %v2784_v61, %v5507_v28  ;;  %v3010_v4 = vpop.f32.mrb[59].mxu1  ;;  %3552 = vmatmul.mubr.bf16.gmra.mrb[84].mxu1 %v3109_v56  ;;  %v3073_v9 = vmax.f32 %v4247_v63, 0.0  ;;  %v3072_v37 = vmax.f32 %v4216_v0, 0.0 }
 0x327   : > { %v3075_v36 = vmax.f32 %v4217_v12, 0.0  ;;  %v4250_v7 = vadd.f32 %v3010_v4, %v5511_v30  ;;  %v3074_v41 = vmax.f32 %v4248_v10, 0.0 }
 0x328   : > { %v3077_v11 = vmax.f32 %v4249_v2, 0.0  ;;  %v3076_v39 = vmax.f32 %v4218_v3, 0.0 }
 0x329   : > { %v3111_v42 = vpack.c.bf16 %v3075_v36, %v3071_v5  ;;  %v3078_v35 = vmax.f32 %v4250_v7, 0.0 }
 0x32a   : > { %v3113_v40 = vpack.c.bf16 %v3077_v11, %v3073_v9  ;;  %v3112_v13 = vpack.c.bf16 %v3076_v39, %v3072_v37  ;;  %v2788_v14 = vpop.f32.mrb[60].mxu0 }
 0x32b   : > { %v3114_v15 = vpack.c.bf16 %v3078_v35, %v3074_v41  ;;  %v4219_v16 = vadd.f32 %v2788_v14, %v5499_v46  ;;  %v3014_v43 = vpop.f32.mrb[60].mxu1  ;;  %v2790_v44 = vpop.f32.mrb[61].mxu0 }
 0x32c   : > { %v4251_v17 = vadd.f32 %v3014_v43, %v5503_v48  ;;  %v4220_v18 = vadd.f32 %v2790_v44, %v5507_v28  ;;  %v3016_v19 = vpop.f32.mrb[61].mxu1  ;;  %v2792_v20 = vpop.f32.mrb[62].mxu0  ;;  %3462 = vmatprep.mubr.bf16.mxu0 %v3112_v13 }
 0x32d   : > { %v4252_v21 = vadd.f32 %v3016_v19, %v5511_v30  ;;  %v4221_v22 = vadd.f32 %v2792_v20, %v5499_v46  ;;  %v3018_v23 = vpop.f32.mrb[62].mxu1  ;;  %3559 = vmatprep.mubr.bf16.mxu1 %v3114_v15  ;;  %v2794_v24 = vpop.f32.mrb[63].mxu0  ;;  %3463 = vmatmul.mubr.bf16.gmra.mrb[88].mxu0 %v3111_v42  ;;  %v3079_v32 = vmax.f32 %v4219_v16, 0.0 }
 0x32e   : > { %v4253_v26 = vadd.f32 %v3018_v23, %v5503_v48  ;;  %v4222_v29 = vadd.f32 %v2794_v24, %v5507_v28  ;;  %v3020_v31 = vpop.f32.mrb[63].mxu1  ;;  %3560 = vmatmul.mubr.bf16.gmra.mrb[88].mxu1 %v3113_v40  ;;  %v3081_v34 = vmax.f32 %v4251_v17, 0.0  ;;  %v3080_v38 = vmax.f32 %v4220_v18, 0.0 }
 0x32f   : > { %v3083_v33 = vmax.f32 %v4221_v22, 0.0  ;;  %v4254_v8 = vadd.f32 %v3020_v31, %v5511_v30  ;;  %v3082_v46 = vmax.f32 %v4252_v21, 0.0  ;;  %v5582_v30 = vld [vmem:[%s5640_s6] ss:$0 sm:$0xff] }
 0x330   : > { %v3085_v45 = vmax.f32 %v4253_v26, 0.0  ;;  %v3084_v47 = vmax.f32 %v4222_v29, 0.0 }
 0x331   : > { %v3115_v49 = vpack.c.bf16 %v3083_v33, %v3079_v32  ;;  %v3086_v50 = vmax.f32 %v4254_v8, 0.0 }
 0x332   : > { %v3117_v6 = vpack.c.bf16 %v3085_v45, %v3081_v34  ;;  %v3116_v53 = vpack.c.bf16 %v3084_v47, %v3080_v38 }
 0x333   : > { %v3118_v52 = vpack.c.bf16 %v3086_v50, %v3082_v46 }
 0x334   : > { %3470 = vmatprep.mubr.bf16.mxu0 %v3116_v53 }
 0x335   : > { %3567 = vmatprep.mubr.bf16.mxu1 %v3118_v52  ;;  %3471 = vmatmul.mubr.bf16.gmra.mrb[92].mxu0 %v3115_v49 }
 0x336   : > { %3568 = vmatmul.mubr.bf16.gmra.mrb[92].mxu1 %v3117_v6 }
 0x3d0   : > { %v4015_v48 = vpop.f32.mrb[64].mxu0 }
 0x3d1   : > { %v4079_v28 = vpop.f32.mrb[64].mxu1  ;;  %v4016_v54 = vpop.f32.mrb[65].mxu0 }
 0x3d2   : > { %v4017_v55 = vadd.f32 %v4016_v54, %v4015_v48  ;;  %v4080_v56 = vpop.f32.mrb[65].mxu1  ;;  %v4018_v57 = vpop.f32.mrb[66].mxu0 }
 0x3d3   : > { %v4081_v58 = vadd.f32 %v4080_v56, %v4079_v28  ;;  %v4082_v51 = vpop.f32.mrb[66].mxu1  ;;  %v4019_v27 = vpop.f32.mrb[67].mxu0 }
 0x3d4   : > { %v3417_v60 = vadd.f32 %v4017_v55, %v5582_v30  ;;  %v4020_v62 = vadd.f32 %v4019_v27, %v4018_v57  ;;  %v4083_v63 = vpop.f32.mrb[67].mxu1 }
 0x3d5   : > { %v4084_v0 = vadd.f32 %v4083_v63, %v4082_v51 }
 0x3d6   : > { %v3514_v1 = vadd.f32 %v4081_v58, %v3417_v60  ;;  %v3420_v25 = vadd.f32 %v4020_v62, %v5582_v30 }
 0x3d8   : > { %3576 = vst [vmem:[%s5588_s11] sm:$0xff] %v3514_v1  ;;  %v3517_v10 = vadd.f32 %v4084_v0, %v3420_v25  ;;  %v4021_v12 = vpop.f32.mrb[68].mxu0 }
 0x3d9   : > { %v4085_v59 = vpop.f32.mrb[68].mxu1  ;;  %v4022_v61 = vpop.f32.mrb[69].mxu0 }
 0x3da   : > { %3577 = vst [vmem:[%s5588_s11 + $0x8] sm:$0xff] %v3517_v10  ;;  %v4023_v2 = vadd.f32 %v4022_v61, %v4021_v12  ;;  %v4086_v3 = vpop.f32.mrb[69].mxu1  ;;  %v4024_v4 = vpop.f32.mrb[70].mxu0 }
 0x3db   : > { %v4087_v5 = vadd.f32 %v4086_v3, %v4085_v59  ;;  %v4088_v36 = vpop.f32.mrb[70].mxu1  ;;  %v4025_v7 = vpop.f32.mrb[71].mxu0 }
 0x3dc   : > { %v3425_v9 = vadd.f32 %v4023_v2, %v5582_v30  ;;  %v4026_v37 = vadd.f32 %v4025_v7, %v4024_v4  ;;  %v4089_v11 = vpop.f32.mrb[71].mxu1 }
 0x3dd   : > { %v4090_v39 = vadd.f32 %v4089_v11, %v4088_v36 }
 0x3de   : > { %v3522_v41 = vadd.f32 %v4087_v5, %v3425_v9  ;;  %v3428_v42 = vadd.f32 %v4026_v37, %v5582_v30 }
 0x3e0   : > { %3578 = vst [vmem:[%s5588_s11 + $0x10] sm:$0xff] %v3522_v41  ;;  %v3525_v35 = vadd.f32 %v4090_v39, %v3428_v42  ;;  %v4027_v40 = vpop.f32.mrb[72].mxu0 }
 0x3e1   : > { %v4091_v13 = vpop.f32.mrb[72].mxu1  ;;  %v4028_v14 = vpop.f32.mrb[73].mxu0 }
 0x3e2   : > { %3579 = vst [vmem:[%s5588_s11 + $0x18] sm:$0xff] %v3525_v35  ;;  %v4029_v15 = vadd.f32 %v4028_v14, %v4027_v40  ;;  %v4092_v16 = vpop.f32.mrb[73].mxu1  ;;  %v4030_v43 = vpop.f32.mrb[74].mxu0 }
 0x3e3   : > { %v4093_v44 = vadd.f32 %v4092_v16, %v4091_v13  ;;  %v4094_v17 = vpop.f32.mrb[74].mxu1  ;;  %v4031_v18 = vpop.f32.mrb[75].mxu0 }
 0x3e4   : > { %v3433_v19 = vadd.f32 %v4029_v15, %v5582_v30  ;;  %v4032_v20 = vadd.f32 %v4031_v18, %v4030_v43  ;;  %v4095_v21 = vpop.f32.mrb[75].mxu1 }
 0x3e5   : > { %v4096_v22 = vadd.f32 %v4095_v21, %v4094_v17 }
 0x3e6   : > { %v3530_v23 = vadd.f32 %v4093_v44, %v3433_v19  ;;  %v3436_v24 = vadd.f32 %v4032_v20, %v5582_v30 }
 0x3e8   : > { %3580 = vst [vmem:[%s5588_s11 + $0x20] sm:$0xff] %v3530_v23  ;;  %v3533_v26 = vadd.f32 %v4096_v22, %v3436_v24  ;;  %v4033_v29 = vpop.f32.mrb[76].mxu0 }
 0x3e9   : > { %v4097_v31 = vpop.f32.mrb[76].mxu1  ;;  %v4034_v32 = vpop.f32.mrb[77].mxu0 }
 0x3ea   : > { %3581 = vst [vmem:[%s5588_s11 + $0x28] sm:$0xff] %v3533_v26  ;;  %v4035_v33 = vadd.f32 %v4034_v32, %v4033_v29  ;;  %v4098_v8 = vpop.f32.mrb[77].mxu1  ;;  %v4036_v34 = vpop.f32.mrb[78].mxu0 }
 0x3eb   : > { %v4099_v38 = vadd.f32 %v4098_v8, %v4097_v31  ;;  %v4100_v45 = vpop.f32.mrb[78].mxu1  ;;  %v4037_v47 = vpop.f32.mrb[79].mxu0 }
 0x3ec   : > { %v3441_v46 = vadd.f32 %v4035_v33, %v5582_v30  ;;  %v4038_v49 = vadd.f32 %v4037_v47, %v4036_v34  ;;  %v4101_v50 = vpop.f32.mrb[79].mxu1 }
 0x3ed   : > { %v4102_v6 = vadd.f32 %v4101_v50, %v4100_v45 }
 0x3ee   : > { %v3538_v53 = vadd.f32 %v4099_v38, %v3441_v46  ;;  %v3444_v52 = vadd.f32 %v4038_v49, %v5582_v30 }
 0x3f0   : > { %3582 = vst [vmem:[%s5588_s11 + $0x30] sm:$0xff] %v3538_v53  ;;  %v3541_v48 = vadd.f32 %v4102_v6, %v3444_v52  ;;  %v4039_v28 = vpop.f32.mrb[80].mxu0 }
 0x3f1   : > { %v4103_v54 = vpop.f32.mrb[80].mxu1  ;;  %v4040_v55 = vpop.f32.mrb[81].mxu0 }
 0x3f2   : > { %3583 = vst [vmem:[%s5588_s11 + $0x38] sm:$0xff] %v3541_v48  ;;  %v4041_v56 = vadd.f32 %v4040_v55, %v4039_v28  ;;  %v4104_v57 = vpop.f32.mrb[81].mxu1  ;;  %v4042_v58 = vpop.f32.mrb[82].mxu0 }
 0x3f3   : > { %v4105_v51 = vadd.f32 %v4104_v57, %v4103_v54  ;;  %v4106_v27 = vpop.f32.mrb[82].mxu1  ;;  %v4043_v60 = vpop.f32.mrb[83].mxu0 }
 0x3f4   : > { %v3449_v62 = vadd.f32 %v4041_v56, %v5582_v30  ;;  %v4044_v63 = vadd.f32 %v4043_v60, %v4042_v58  ;;  %v4107_v0 = vpop.f32.mrb[83].mxu1 }
 0x3f5   : > { %v4108_v1 = vadd.f32 %v4107_v0, %v4106_v27 }
 0x3f6   : > { %v3546_v25 = vadd.f32 %v4105_v51, %v3449_v62  ;;  %v3452_v10 = vadd.f32 %v4044_v63, %v5582_v30 }
 0x3f8   : > { %3584 = vst [vmem:[%s5588_s11 + $0x40] sm:$0xff] %v3546_v25  ;;  %v3549_v12 = vadd.f32 %v4108_v1, %v3452_v10  ;;  %v4045_v59 = vpop.f32.mrb[84].mxu0 }
 0x3f9   : > { %v4109_v61 = vpop.f32.mrb[84].mxu1  ;;  %v4046_v2 = vpop.f32.mrb[85].mxu0 }
 0x3fa   : > { %3585 = vst [vmem:[%s5588_s11 + $0x48] sm:$0xff] %v3549_v12  ;;  %v4047_v3 = vadd.f32 %v4046_v2, %v4045_v59  ;;  %v4110_v4 = vpop.f32.mrb[85].mxu1  ;;  %v4048_v5 = vpop.f32.mrb[86].mxu0 }
 0x3fb   : > { %v4111_v36 = vadd.f32 %v4110_v4, %v4109_v61  ;;  %v4112_v7 = vpop.f32.mrb[86].mxu1  ;;  %v4049_v9 = vpop.f32.mrb[87].mxu0 }
 0x3fc   : > { %v3457_v37 = vadd.f32 %v4047_v3, %v5582_v30  ;;  %v4050_v11 = vadd.f32 %v4049_v9, %v4048_v5  ;;  %v4113_v39 = vpop.f32.mrb[87].mxu1 }
 0x3fd   : > { %v4114_v41 = vadd.f32 %v4113_v39, %v4112_v7 }
 0x3fe   : > { %v3554_v42 = vadd.f32 %v4111_v36, %v3457_v37  ;;  %v3460_v35 = vadd.f32 %v4050_v11, %v5582_v30 }
 0x400   : > { %3586 = vst [vmem:[%s5588_s11 + $0x50] sm:$0xff] %v3554_v42  ;;  %v3557_v40 = vadd.f32 %v4114_v41, %v3460_v35  ;;  %v4051_v13 = vpop.f32.mrb[88].mxu0 }
 0x401   : > { %v4115_v14 = vpop.f32.mrb[88].mxu1  ;;  %v4052_v15 = vpop.f32.mrb[89].mxu0 }
 0x402   : > { %3587 = vst [vmem:[%s5588_s11 + $0x58] sm:$0xff] %v3557_v40  ;;  %v4053_v16 = vadd.f32 %v4052_v15, %v4051_v13  ;;  %v4116_v43 = vpop.f32.mrb[89].mxu1  ;;  %v4054_v44 = vpop.f32.mrb[90].mxu0 }
 0x403   : > { %v4117_v17 = vadd.f32 %v4116_v43, %v4115_v14  ;;  %v4118_v18 = vpop.f32.mrb[90].mxu1  ;;  %v4055_v19 = vpop.f32.mrb[91].mxu0 }
 0x404   : > { %v3465_v20 = vadd.f32 %v4053_v16, %v5582_v30  ;;  %v4056_v21 = vadd.f32 %v4055_v19, %v4054_v44  ;;  %v4119_v22 = vpop.f32.mrb[91].mxu1 }
 0x405   : > { %v4120_v23 = vadd.f32 %v4119_v22, %v4118_v18 }
 0x406   : > { %v3562_v24 = vadd.f32 %v4117_v17, %v3465_v20  ;;  %v3468_v26 = vadd.f32 %v4056_v21, %v5582_v30 }
 0x408   : > { %3588 = vst [vmem:[%s5588_s11 + $0x60] sm:$0xff] %v3562_v24  ;;  %v3565_v29 = vadd.f32 %v4120_v23, %v3468_v26  ;;  %v4057_v31 = vpop.f32.mrb[92].mxu0 }
 0x409   : > { %v4121_v32 = vpop.f32.mrb[92].mxu1  ;;  %v4058_v33 = vpop.f32.mrb[93].mxu0 }
 0x40a   : > { %3589 = vst [vmem:[%s5588_s11 + $0x68] sm:$0xff] %v3565_v29  ;;  %v4059_v8 = vadd.f32 %v4058_v33, %v4057_v31  ;;  %v4122_v34 = vpop.f32.mrb[93].mxu1  ;;  %v4060_v38 = vpop.f32.mrb[94].mxu0 }
 0x40b   : > { %v4123_v45 = vadd.f32 %v4122_v34, %v4121_v32  ;;  %v4124_v47 = vpop.f32.mrb[94].mxu1  ;;  %v4061_v46 = vpop.f32.mrb[95].mxu0 }
 0x40c   : > { %v3473_v49 = vadd.f32 %v4059_v8, %v5582_v30  ;;  %v4062_v50 = vadd.f32 %v4061_v46, %v4060_v38  ;;  %v4125_v6 = vpop.f32.mrb[95].mxu1 }
 0x40d   : > { %v4126_v53 = vadd.f32 %v4125_v6, %v4124_v47 }
 0x40e   : > { %v3570_v52 = vadd.f32 %v4123_v45, %v3473_v49  ;;  %v3476_v48 = vadd.f32 %v4062_v50, %v5582_v30 }
 0x410   : > { %3590 = vst [vmem:[%s5588_s11 + $0x70] sm:$0xff] %v3570_v52  ;;  %v3573_v28 = vadd.f32 %v4126_v53, %v3476_v48 }
 0x412   : > { %3591 = vst [vmem:[%s5588_s11 + $0x78] sm:$0xff] %v3573_v28 }
 0x413 PF: > { %p19_p11 = scmp.ge.s32.totalorder %s5207_s14, 4   ;;  %s5655_s24 = smov %s5023_s25 }
 0x414   : > { %s5656_s25 = smov %s5027_s26  ;;  %s5657_s26 = smov %s5217_s18 }
 0x415   : > { %s5658_s27 = smov %s5207_s14  ;;  %21 = sbr.rel (!%p19_p11) target bundleno = 5 (0x5), region = 100 }
 0x41c   :  { %3614 = vsyncpa [#allocation3], 1 }
 0x41d   :  { %3616 = vsyncpa [#allocation3 + $0x1], 1 }
 0x41e   :  { %3617 = vsyncpa [#allocation5], 1 }
 0x41f   :  { %3618 = vsyncpa [#allocation8], 1 }

</bundles_post_ra>
